<compile_context>
chip_gen: v7x
topology: tpu7x:2x2x1
jax: 0.10.0
libtpu: 0.0.40
codegen_flags: <defaults>
</compile_context>

<pallas_src>
import functools

import jax
import jax.numpy as jnp
from jax.experimental import pallas as pl
from jax.experimental.pallas import tpu as pltpu

_VMEM_LIMIT = 32 * 1024 * 1024   # explicit scoped-VMEM budget (safe on v5e/v6e/v7x)
_EPS = 1e-5                      # nn.LayerNorm default eps
_NEG_INF = -1e30


def _round_up(x, m):
    return ((x + m - 1) // m) * m


def _layernorm(x, gamma, beta, eps):
    """LayerNorm over the last axis in f32.  Shared by kernels and reference."""
    mu = jnp.mean(x, axis=-1, keepdims=True)
    var = jnp.mean(jnp.square(x - mu), axis=-1, keepdims=True)
    return (x - mu) * jax.lax.rsqrt(var + eps) * gamma + beta


# --------------------------------------------------------------------------- #
# Kernel 1: token-embedding gather (as a one-hot matmul on the MXU) + pos add  #
# --------------------------------------------------------------------------- #
def _embed_kernel(idx_ref, tok_ref, pos_ref, o_ref):
    # idx_ref: (1, T, 1) int32 | tok_ref: (V, E) f32 | pos_ref: (T, E) f32
    # o_ref  : (1, T, E) f32
    idx = idx_ref[0]                                            # (T, 1)
    T = idx.shape[0]
    V = tok_ref.shape[0]
    onehot = jax.lax.broadcasted_iota(jnp.int32, (T, V), 1) == idx
    tok = jnp.dot(onehot.astype(jnp.float32), tok_ref[...],
                  preferred_element_type=jnp.float32)           # row select on MXU
    o_ref[0] = (tok + pos_ref[...]).astype(o_ref.dtype)


def _embed_call(idx3, tok_table, pos_t):
    B, T, _ = idx3.shape
    V, E = tok_table.shape
    cost = pl.CostEstimate(flops=2 * B * T * V * E, transcendentals=0,
                           bytes_accessed=4 * (B * T + V * E + T * E + B * T * E))
    return pl.pallas_call(
        _embed_kernel,
        out_shape=jax.ShapeDtypeStruct((B, T, E), jnp.float32),
        grid_spec=pltpu.PrefetchScalarGridSpec(
            num_scalar_prefetch=0,
            grid=(B,),
            in_specs=[
                pl.BlockSpec((1, T, 1), lambda b: (b, 0, 0)),
                pl.BlockSpec((V, E), lambda b: (0, 0)),
                pl.BlockSpec((T, E), lambda b: (0, 0)),
            ],
            out_specs=pl.BlockSpec((1, T, E), lambda b: (b, 0, 0)),
        ),
        compiler_params=pltpu.CompilerParams(
            dimension_semantics=("parallel",), vmem_limit_bytes=_VMEM_LIMIT),
        cost_estimate=cost,
    )(idx3, tok_table, pos_t)


# --------------------------------------------------------------------------- #
# Kernel 2: fused transformer block                                            #
#   x = x + MHA(LN1(x));  x = x + FFN(LN2(x))      (per batch element)         #
# --------------------------------------------------------------------------- #
def _make_block_kernel(n_head, eps):
    def kernel(x_ref, ln1g_ref, ln1b_ref, wq_ref, wk_ref, wv_ref, wo_ref, bo_ref,
               ln2g_ref, ln2b_ref, w1_ref, b1_ref, w2_ref, b2_ref, o_ref):
        x = x_ref[0]                          # (T, E) residual stream, f32
        T, E = x.shape
        hs = E // n_head
        dt = wq_ref.dtype                     # matmul operand dtype (bf16 by default)

        # ---- multi-head causal self-attention on LN1(x) ----
        xn = _layernorm(x, ln1g_ref[...], ln1b_ref[...], eps).astype(dt)
        q = jnp.dot(xn, wq_ref[...], preferred_element_type=jnp.float32)
        k = jnp.dot(xn, wk_ref[...], preferred_element_type=jnp.float32)
        v = jnp.dot(xn, wv_ref[...], preferred_element_type=jnp.float32)
        wo = wo_ref[...]

        row = jax.lax.broadcasted_iota(jnp.int32, (T, T), 0)
        col = jax.lax.broadcasted_iota(jnp.int32, (T, T), 1)
        causal = col <= row
        inv_sqrt_hs = 1.0 / (hs ** 0.5)

        sa = jnp.zeros((T, E), jnp.float32)
        for h in range(n_head):               # n_head is small & static -> unrolled
            sl = slice(h * hs, (h + 1) * hs)
            qh = q[:, sl].astype(dt)
            kh = k[:, sl].astype(dt)
            vh = v[:, sl].astype(dt)
            s = jax.lax.dot_general(qh, kh, (((1,), (1,)), ((), ())),
                                    preferred_element_type=jnp.float32)
            s = s * inv_sqrt_hs
            s = jnp.where(causal, s, _NEG_INF)
            m = jnp.max(s, axis=-1, keepdims=True)
            e = jnp.exp(s - m)
            p = e / jnp.sum(e, axis=-1, keepdims=True)            # (T, T) f32
            ah = jnp.dot(p.astype(dt), vh, preferred_element_type=jnp.float32)
            # head-concat folded into the projection: sum_h ah @ Wo[h*hs:(h+1)*hs]
            sa = sa + jnp.dot(ah.astype(dt), wo[sl, :],
                              preferred_element_type=jnp.float32)
        x = x + (sa + bo_ref[...])

        # ---- feed-forward (Linear -> ReLU -> Linear) on LN2(x) ----
        xn2 = _layernorm(x, ln2g_ref[...], ln2b_ref[...], eps).astype(dt)
        h1 = jnp.dot(xn2, w1_ref[...], preferred_element_type=jnp.float32) + b1_ref[...]
        h1 = jnp.maximum(h1, 0.0)
        y = jnp.dot(h1.astype(dt), w2_ref[...], preferred_element_type=jnp.float32) + b2_ref[...]
        o_ref[0] = (x + y).astype(o_ref.dtype)

    return kernel


def _block_call(x, blk, *, n_head, eps, matmul_dtype):
    B, T, E = x.shape
    H = blk['w1'].shape[1]
    dt = matmul_dtype
    isz = jnp.dtype(dt).itemsize

    # Pre-cast weights once (halves their DMA bytes); keep biases / LN in f32.
    wq, wk, wv, wo = (blk[n].astype(dt) for n in ('wq', 'wk', 'wv', 'wo'))
    w1, w2 = blk['w1'].astype(dt), blk['w2'].astype(dt)
    ln1g, ln1b = blk['ln1_g'].reshape(1, E), blk['ln1_b'].reshape(1, E)
    ln2g, ln2b = blk['ln2_g'].reshape(1, E), blk['ln2_b'].reshape(1, E)
    bo, b1, b2 = blk['bo'].reshape(1, E), blk['b1'].reshape(1, H), blk['b2'].reshape(1, E)

    cost = pl.CostEstimate(
        flops=B * (8 * T * E * E + 4 * T * T * E + 4 * T * E * H),
        transcendentals=B * (n_head * T * T + 4 * T),
        bytes_accessed=8 * B * T * E + (4 * E * E + 2 * E * H) * isz + 4 * (7 * E + H))

    const = lambda b: (0, 0)   # invariant operands (weights / biases / LN params)
    return pl.pallas_call(
        _make_block_kernel(n_head, eps),
        out_shape=jax.ShapeDtypeStruct((B, T, E), jnp.float32),
        grid_spec=pltpu.PrefetchScalarGridSpec(
            num_scalar_prefetch=0,
            grid=(B,),
            in_specs=[
                pl.BlockSpec((1, T, E), lambda b: (b, 0, 0)),              # x
                pl.BlockSpec((1, E), const), pl.BlockSpec((1, E), const),  # ln1 g/b
                pl.BlockSpec((E, E), const), pl.BlockSpec((E, E), const),  # wq, wk
                pl.BlockSpec((E, E), const), pl.BlockSpec((E, E), const),  # wv, wo
                pl.BlockSpec((1, E), const),                               # bo
                pl.BlockSpec((1, E), const), pl.BlockSpec((1, E), const),  # ln2 g/b
                pl.BlockSpec((E, H), const), pl.BlockSpec((1, H), const),  # w1, b1
                pl.BlockSpec((H, E), const), pl.BlockSpec((1, E), const),  # w2, b2
            ],
            out_specs=pl.BlockSpec((1, T, E), lambda b: (b, 0, 0)),
        ),
        compiler_params=pltpu.CompilerParams(
            dimension_semantics=("parallel",), vmem_limit_bytes=_VMEM_LIMIT),
        cost_estimate=cost,
    )(x, ln1g, ln1b, wq, wk, wv, wo, bo, ln2g, ln2b, w1, b1, w2, b2)


# --------------------------------------------------------------------------- #
# Kernel 3: final LayerNorm + lm_head (lane-dense, padded vocab)               #
# --------------------------------------------------------------------------- #
def _make_head_kernel(eps):
    def kernel(x_ref, g_ref, b_ref, wh_ref, bh_ref, o_ref):
        xn = _layernorm(x_ref[...], g_ref[...], b_ref[...], eps)
        dt = wh_ref.dtype
        logits = jnp.dot(xn.astype(dt), wh_ref[...],
                         preferred_element_type=jnp.float32) + bh_ref[...]
        o_ref[...] = logits.astype(o_ref.dtype)
    return kernel


def _head_call(x2d, lnf_g, lnf_b, wh_pad, bh_pad, *, tm, eps):
    Mp, E = x2d.shape
    Vp = wh_pad.shape[1]
    isz = wh_pad.dtype.itemsize
    cost = pl.CostEstimate(flops=2 * Mp * E * Vp, transcendentals=Mp,
                           bytes_accessed=4 * Mp * E + E * Vp * isz + 4 * Mp * Vp)
    return pl.pallas_call(
        _make_head_kernel(eps),
        out_shape=jax.ShapeDtypeStruct((Mp, Vp), jnp.float32),
        grid_spec=pltpu.PrefetchScalarGridSpec(
            num_scalar_prefetch=0,
            grid=(Mp // tm,),
            in_specs=[
                pl.BlockSpec((tm, E), lambda i: (i, 0)),
                pl.BlockSpec((1, E), lambda i: (0, 0)),
                pl.BlockSpec((1, E), lambda i: (0, 0)),
                pl.BlockSpec((E, Vp), lambda i: (0, 0)),
                pl.BlockSpec((1, Vp), lambda i: (0, 0)),
            ],
            out_specs=pl.BlockSpec((tm, Vp), lambda i: (i, 0)),  # Vp % 128 == 0 -> dense vst
        ),
        compiler_params=pltpu.CompilerParams(
            dimension_semantics=("parallel",), vmem_limit_bytes=_VMEM_LIMIT),
        cost_estimate=cost,
    )(x2d, lnf_g, lnf_b, wh_pad, bh_pad)


# --------------------------------------------------------------------------- #
# Full forward pass (logits only; loss path with targets is not implemented)   #
# --------------------------------------------------------------------------- #
def bigram_lm_forward(params, idx, *, n_head, eps=_EPS,
                      matmul_dtype=jnp.bfloat16, tm=256):
    """idx: (B, T) int32  ->  logits: (B, T, vocab) f32."""
    B, T = idx.shape
    V, E = params['tok_table'].shape
    dt = matmul_dtype

    # 1) token + position embeddings.
    idx3 = idx.astype(jnp.int32).reshape(B, T, 1)
    x = _embed_call(idx3, params['tok_table'], params['pos_table'][:T])

    # 2) transformer blocks.
    for blk in params['blocks']:
        x = _block_call(x, blk, n_head=n_head, eps=eps, matmul_dtype=dt)

    # 3) final LN + lm_head; pad vocab to 128 lanes, pad rows instead of asserting.
    M = B * T
    Vp = _round_up(V, 128)
    wh_pad = jnp.pad(params['wh'].astype(dt), ((0, 0), (0, Vp - V)))
    bh_pad = jnp.pad(params['bh'], (0, Vp - V)).reshape(1, Vp)
    tm_eff = min(tm, _round_up(M, 8))
    Mp = _round_up(M, tm_eff)
    x2d = x.reshape(M, E)
    if Mp != M:
        x2d = jnp.pad(x2d, ((0, Mp - M), (0, 0)))
    logits2d = _head_call(x2d, params['lnf_g'].reshape(1, E),
                          params['lnf_b'].reshape(1, E), wh_pad, bh_pad,
                          tm=tm_eff, eps=eps)
    return logits2d[:M, :V].reshape(B, T, V)


# --------------------------------------------------------------------------- #
# Pure-jnp reference (same math and same bf16 cast points as the kernels)      #
# --------------------------------------------------------------------------- #
def bigram_lm_ref(params, idx, *, n_head, eps=_EPS, matmul_dtype=jnp.bfloat16):
    dt = matmul_dtype
    f32 = jnp.float32
    B, T = idx.shape
    V, E = params['tok_table'].shape
    hs = E // n_head

    x = params['tok_table'][idx] + params['pos_table'][:T][None]
    causal = jnp.tril(jnp.ones((T, T), dtype=bool))[None, None]
    for blk in params['blocks']:
        xn = _layernorm(x, blk['ln1_g'], blk['ln1_b'], eps).astype(dt)
        q = jnp.einsum('bte,ef->btf', xn, blk['wq'].astype(dt), preferred_element_type=f32)
        k = jnp.einsum('bte,ef->btf', xn, blk['wk'].astype(dt), preferred_element_type=f32)
        v = jnp.einsum('bte,ef->btf', xn, blk['wv'].astype(dt), preferred_element_type=f32)
        q = q.reshape(B, T, n_head, hs)
        k = k.reshape(B, T, n_head, hs)
        v = v.reshape(B, T, n_head, hs)
        s = jnp.einsum('bqhd,bkhd->bhqk', q.astype(dt), k.astype(dt),
                       preferred_element_type=f32) * (1.0 / (hs ** 0.5))
        s = jnp.where(causal, s, _NEG_INF)
        p = jax.nn.softmax(s, axis=-1)
        att = jnp.einsum('bhqk,bkhd->bqhd', p.astype(dt), v.astype(dt),
                         preferred_element_type=f32).reshape(B, T, E)
        sa = jnp.einsum('bte,ef->btf', att.astype(dt), blk['wo'].astype(dt),
                        preferred_element_type=f32) + blk['bo']
        x = x + sa
        xn2 = _layernorm(x, blk['ln2_g'], blk['ln2_b'], eps).astype(dt)
        h1 = jnp.maximum(jnp.einsum('bte,eh->bth', xn2, blk['w1'].astype(dt),
                                    preferred_element_type=f32) + blk['b1'], 0.0)
        y = jnp.einsum('bth,he->bte', h1.astype(dt), blk['w2'].astype(dt),
                       preferred_element_type=f32) + blk['b2']
        x = x + y
    xn = _layernorm(x, params['lnf_g'], params['lnf_b'], eps).astype(dt)
    return jnp.einsum('bte,ev->btv', xn, params['wh'].astype(dt),
                      preferred_element_type=f32) + params['bh']


# --------------------------------------------------------------------------- #
# Deterministic parameter init (mirrors the nn.Module shapes, stored (in,out)) #
# --------------------------------------------------------------------------- #
def init_params(key, vocab_size, n_embd, block_size, n_head, n_layer):
    E, H = n_embd, 4 * n_embd
    k_tok, k_pos, k_head, k_blocks = jax.random.split(key, 4)

    def linear(k, fan_in, fan_out, bias=True):
        kw, kb = jax.random.split(k)
        s = 1.0 / (fan_in ** 0.5)
        w = jax.random.uniform(kw, (fan_in, fan_out), jnp.float32, -s, s)
        b = jax.random.uniform(kb, (fan_out,), jnp.float32, -s, s) if bias else None
        return w, b

    blocks = []
    for kb in jax.random.split(k_blocks, n_layer):
        kq, kk, kv, ko, k1, k2 = jax.random.split(kb, 6)
        wq, _ = linear(kq, E, E, bias=False)
        wk, _ = linear(kk, E, E, bias=False)
        wv, _ = linear(kv, E, E, bias=False)
        wo, bo = linear(ko, E, E)
        w1, b1 = linear(k1, E, H)
        w2, b2 = linear(k2, H, E)
        blocks.append(dict(
            ln1_g=jnp.ones((E,), jnp.float32), ln1_b=jnp.zeros((E,), jnp.float32),
            wq=wq, wk=wk, wv=wv, wo=wo, bo=bo,
            ln2_g=jnp.ones((E,), jnp.float32), ln2_b=jnp.zeros((E,), jnp.float32),
            w1=w1, b1=b1, w2=w2, b2=b2))

    wh, bh = linear(k_head, E, vocab_size)
    return dict(
        tok_table=jax.random.normal(k_tok, (vocab_size, E), jnp.float32),
        pos_table=jax.random.normal(k_pos, (block_size, E), jnp.float32),
        blocks=blocks,
        lnf_g=jnp.ones((E,), jnp.float32), lnf_b=jnp.zeros((E,), jnp.float32),
        wh=wh, bh=bh)


if __name__ == "__main__":
    VOCAB, N_EMBD, BLOCK_SIZE, N_HEAD, N_LAYER = 65, 32, 8, 4, 2
    B, T = 2, 8

    key = jax.random.PRNGKey(0)
    k_params, k_idx = jax.random.split(key)
    params = init_params(k_params, VOCAB, N_EMBD, BLOCK_SIZE, N_HEAD, N_LAYER)
    idx = jax.random.randint(k_idx, (B, T), 0, VOCAB, dtype=jnp.int32)

    fwd = jax.jit(functools.partial(bigram_lm_forward, n_head=N_HEAD,
                                    matmul_dtype=jnp.bfloat16))
    logits = fwd(params, idx)
    jax.block_until_ready(logits)

    ref = bigram_lm_ref(params, idx, n_head=N_HEAD, matmul_dtype=jnp.bfloat16)
    assert logits.shape == (B, T, VOCAB)
    max_err = float(jnp.max(jnp.abs(logits - ref)))
    assert jnp.allclose(logits, ref, atol=1e-2, rtol=1e-2), f"max abs err {max_err}"
    print("KERNEL_OK")
</pallas_src>

<mosaic_0001>
module attributes {stable_mosaic.version = 11 : i64} {
  func.func @_embed_kernel(%arg0: i32, %arg1: memref<1x8x1xi32, #tpu.memory_space<vmem>>, %arg2: memref<65x32xf32, #tpu.memory_space<vmem>>, %arg3: memref<8x32xf32, #tpu.memory_space<vmem>>, %arg4: memref<1x8x32xf32, #tpu.memory_space<vmem>>) attributes {dimension_semantics = [#tpu.dimension_semantics<parallel>], iteration_bounds = array<i64: 2>, scalar_prefetch = 0 : i64, scratch_operands = 0 : i64, tpu.core_type = #tpu.core_type<tc>, window_params = [{transform_indices = @transform_0, window_bounds = array<i64: 1, 8, 1>}, {pipeline_mode = #tpu.pipeline_mode<synchronous>, transform_indices = @transform_1, window_bounds = array<i64: 65, 32>}, {pipeline_mode = #tpu.pipeline_mode<synchronous>, transform_indices = @transform_2, window_bounds = array<i64: 8, 32>}, {transform_indices = @transform_3, window_bounds = array<i64: 1, 8, 32>}]} {
    %c0 = arith.constant 0 : index
    %c0_0 = arith.constant 0 : index
    %c0_1 = arith.constant 0 : index
    %0 = vector.load %arg1[%c0, %c0_0, %c0_1] : memref<1x8x1xi32, #tpu.memory_space<vmem>>, vector<1x8x1xi32>
    %1 = vector.shape_cast %0 : vector<1x8x1xi32> to vector<8x1xi32>
    %2 = tpu.iota {dimensions = array<i32: 1>} : vector<8x65xi32>
    %3 = vector.broadcast %1 : vector<8x1xi32> to vector<8x65xi32>
    %4 = arith.cmpi eq, %2, %3 : vector<8x65xi32>
    %5 = arith.extui %4 : vector<8x65xi1> to vector<8x65xi32>
    %6 = arith.sitofp %5 : vector<8x65xi32> to vector<8x65xf32>
    %c0_2 = arith.constant 0 : index
    %c0_3 = arith.constant 0 : index
    %7 = vector.load %arg2[%c0_2, %c0_3] : memref<65x32xf32, #tpu.memory_space<vmem>>, vector<65x32xf32>
    %cst = arith.constant dense<0.000000e+00> : vector<8x32xf32>
    %8 = tpu.matmul %6, %7, %cst {dimension_numbers = #tpu.dot_dimension_numbers<[1], [0], [0], [1], [0, 0, 1, 1], [], []>} : vector<8x65xf32>, vector<65x32xf32>, vector<8x32xf32> -> vector<8x32xf32>
    %c0_4 = arith.constant 0 : index
    %c0_5 = arith.constant 0 : index
    %9 = vector.load %arg3[%c0_4, %c0_5] : memref<8x32xf32, #tpu.memory_space<vmem>>, vector<8x32xf32>
    %10 = arith.addf %8, %9 : vector<8x32xf32>
    %c0_6 = arith.constant 0 : index
    %c0_7 = arith.constant 0 : index
    %c0_8 = arith.constant 0 : index
    %11 = vector.load %arg4[%c0_6, %c0_7, %c0_8] : memref<1x8x32xf32, #tpu.memory_space<vmem>>, vector<1x8x32xf32>
    %12 = vector.shape_cast %11 : vector<1x8x32xf32> to vector<8x32xf32>
    %13 = vector.shape_cast %10 : vector<8x32xf32> to vector<1x8x32xf32>
    tpu.vector_store %arg4[%c0_6, %c0_7, %c0_8], %13 {strides = array<i32>} : memref<1x8x32xf32, #tpu.memory_space<vmem>>, vector<1x8x32xf32>,
    return
  }
  func.func @transform_0(%arg0: i32) -> (i32, i32, i32) {
    %c0_i32 = arith.constant 0 : i32
    %c0_i32_0 = arith.constant 0 : i32
    %c0_i32_1 = arith.constant 0 : i32
    return %arg0, %c0_i32, %c0_i32_0 : i32, i32, i32
  }
  func.func @transform_1(%arg0: i32) -> (i32, i32) {
    %c0_i32 = arith.constant 0 : i32
    %c0_i32_0 = arith.constant 0 : i32
    %c0_i32_1 = arith.constant 0 : i32
    return %c0_i32, %c0_i32_0 : i32, i32
  }
  func.func @transform_2(%arg0: i32) -> (i32, i32) {
    %c0_i32 = arith.constant 0 : i32
    %c0_i32_0 = arith.constant 0 : i32
    %c0_i32_1 = arith.constant 0 : i32
    return %c0_i32, %c0_i32_0 : i32, i32
  }
  func.func @transform_3(%arg0: i32) -> (i32, i32, i32) {
    %c0_i32 = arith.constant 0 : i32
    %c0_i32_0 = arith.constant 0 : i32
    %c0_i32_1 = arith.constant 0 : i32
    return %arg0, %c0_i32, %c0_i32_0 : i32, i32, i32
  }
}

module attributes {stable_mosaic.version = 11 : i64} {
  func.func @kernel(%arg0: i32, %arg1: memref<1x8x32xf32, #tpu.memory_space<vmem>>, %arg2: memref<1x32xf32, #tpu.memory_space<vmem>>, %arg3: memref<1x32xf32, #tpu.memory_space<vmem>>, %arg4: memref<32x32xbf16, #tpu.memory_space<vmem>>, %arg5: memref<32x32xbf16, #tpu.memory_space<vmem>>, %arg6: memref<32x32xbf16, #tpu.memory_space<vmem>>, %arg7: memref<32x32xbf16, #tpu.memory_space<vmem>>, %arg8: memref<1x32xf32, #tpu.memory_space<vmem>>, %arg9: memref<1x32xf32, #tpu.memory_space<vmem>>, %arg10: memref<1x32xf32, #tpu.memory_space<vmem>>, %arg11: memref<32x128xbf16, #tpu.memory_space<vmem>>, %arg12: memref<1x128xf32, #tpu.memory_space<vmem>>, %arg13: memref<128x32xbf16, #tpu.memory_space<vmem>>, %arg14: memref<1x32xf32, #tpu.memory_space<vmem>>, %arg15: memref<1x8x32xf32, #tpu.memory_space<vmem>>) attributes {dimension_semantics = [#tpu.dimension_semantics<parallel>], iteration_bounds = array<i64: 2>, scalar_prefetch = 0 : i64, scratch_operands = 0 : i64, tpu.core_type = #tpu.core_type<tc>, window_params = [{transform_indices = @transform_0, window_bounds = array<i64: 1, 8, 32>}, {pipeline_mode = #tpu.pipeline_mode<synchronous>, transform_indices = @transform_1, window_bounds = array<i64: 1, 32>}, {pipeline_mode = #tpu.pipeline_mode<synchronous>, transform_indices = @transform_2, window_bounds = array<i64: 1, 32>}, {pipeline_mode = #tpu.pipeline_mode<synchronous>, transform_indices = @transform_3, window_bounds = array<i64: 32, 32>}, {pipeline_mode = #tpu.pipeline_mode<synchronous>, transform_indices = @transform_4, window_bounds = array<i64: 32, 32>}, {pipeline_mode = #tpu.pipeline_mode<synchronous>, transform_indices = @transform_5, window_bounds = array<i64: 32, 32>}, {pipeline_mode = #tpu.pipeline_mode<synchronous>, transform_indices = @transform_6, window_bounds = array<i64: 32, 32>}, {pipeline_mode = #tpu.pipeline_mode<synchronous>, transform_indices = @transform_7, window_bounds = array<i64: 1, 32>}, {pipeline_mode = #tpu.pipeline_mode<synchronous>, transform_indices = @transform_8, window_bounds = array<i64: 1, 32>}, {pipeline_mode = #tpu.pipeline_mode<synchronous>, transform_indices = @transform_9, window_bounds = array<i64: 1, 32>}, {pipeline_mode = #tpu.pipeline_mode<synchronous>, transform_indices = @transform_10, window_bounds = array<i64: 32, 128>}, {pipeline_mode = #tpu.pipeline_mode<synchronous>, transform_indices = @transform_11, window_bounds = array<i64: 1, 128>}, {pipeline_mode = #tpu.pipeline_mode<synchronous>, transform_indices = @transform_12, window_bounds = array<i64: 128, 32>}, {pipeline_mode = #tpu.pipeline_mode<synchronous>, transform_indices = @transform_13, window_bounds = array<i64: 1, 32>}, {transform_indices = @transform_14, window_bounds = array<i64: 1, 8, 32>}]} {
    %c0 = arith.constant 0 : index
    %c0_0 = arith.constant 0 : index
    %c0_1 = arith.constant 0 : index
    %0 = vector.load %arg1[%c0, %c0_0, %c0_1] : memref<1x8x32xf32, #tpu.memory_space<vmem>>, vector<1x8x32xf32>
    %1 = vector.shape_cast %0 : vector<1x8x32xf32> to vector<8x32xf32>
    %c0_2 = arith.constant 0 : index
    %c0_3 = arith.constant 0 : index
    %2 = vector.load %arg2[%c0_2, %c0_3] : memref<1x32xf32, #tpu.memory_space<vmem>>, vector<1x32xf32>
    %c0_4 = arith.constant 0 : index
    %c0_5 = arith.constant 0 : index
    %3 = vector.load %arg3[%c0_4, %c0_5] : memref<1x32xf32, #tpu.memory_space<vmem>>, vector<1x32xf32>
    %cst = arith.constant dense<0.000000e+00> : vector<8xf32>
    %4 = vector.multi_reduction <add>, %1, %cst [1] : vector<8x32xf32> to vector<8xf32>
    %5 = vector.shape_cast %4 : vector<8xf32> to vector<8x1xf32>
    %cst_6 = arith.constant 3.200000e+01 : f32
    %6 = vector.broadcast %cst_6 : f32 to vector<8x1xf32>
    %7 = arith.divf %5, %6 : vector<8x1xf32>
    %8 = vector.broadcast %7 : vector<8x1xf32> to vector<8x32xf32>
    %9 = arith.subf %1, %8 : vector<8x32xf32>
    %10 = arith.mulf %9, %9 : vector<8x32xf32>
    %cst_7 = arith.constant dense<0.000000e+00> : vector<8xf32>
    %11 = vector.multi_reduction <add>, %10, %cst_7 [1] : vector<8x32xf32> to vector<8xf32>
    %12 = vector.shape_cast %11 : vector<8xf32> to vector<8x1xf32>
    %cst_8 = arith.constant 3.200000e+01 : f32
    %13 = vector.broadcast %cst_8 : f32 to vector<8x1xf32>
    %14 = arith.divf %12, %13 : vector<8x1xf32>
    %15 = vector.broadcast %7 : vector<8x1xf32> to vector<8x32xf32>
    %16 = arith.subf %1, %15 : vector<8x32xf32>
    %cst_9 = arith.constant 9.99999974E-6 : f32
    %17 = vector.broadcast %cst_9 : f32 to vector<8x1xf32>
    %18 = arith.addf %14, %17 : vector<8x1xf32>
    %19 = math.rsqrt %18 : vector<8x1xf32>
    %20 = vector.broadcast %19 : vector<8x1xf32> to vector<8x32xf32>
    %21 = arith.mulf %16, %20 : vector<8x32xf32>
    %22 = vector.broadcast %2 : vector<1x32xf32> to vector<8x32xf32>
    %23 = arith.mulf %21, %22 : vector<8x32xf32>
    %24 = vector.broadcast %3 : vector<1x32xf32> to vector<8x32xf32>
    %25 = arith.addf %23, %24 : vector<8x32xf32>
    %26 = arith.truncf %25 : vector<8x32xf32> to vector<8x32xbf16>
    %c0_10 = arith.constant 0 : index
    %c0_11 = arith.constant 0 : index
    %27 = vector.load %arg4[%c0_10, %c0_11] : memref<32x32xbf16, #tpu.memory_space<vmem>>, vector<32x32xbf16>
    %cst_12 = arith.constant dense<0.000000e+00> : vector<8x32xf32>
    %28 = tpu.matmul %26, %27, %cst_12 {dimension_numbers = #tpu.dot_dimension_numbers<[1], [0], [0], [1], [0, 0, 1, 1], [], []>} : vector<8x32xbf16>, vector<32x32xbf16>, vector<8x32xf32> -> vector<8x32xf32>
    %c0_13 = arith.constant 0 : index
    %c0_14 = arith.constant 0 : index
    %29 = vector.load %arg5[%c0_13, %c0_14] : memref<32x32xbf16, #tpu.memory_space<vmem>>, vector<32x32xbf16>
    %cst_15 = arith.constant dense<0.000000e+00> : vector<8x32xf32>
    %30 = tpu.matmul %26, %29, %cst_15 {dimension_numbers = #tpu.dot_dimension_numbers<[1], [0], [0], [1], [0, 0, 1, 1], [], []>} : vector<8x32xbf16>, vector<32x32xbf16>, vector<8x32xf32> -> vector<8x32xf32>
    %c0_16 = arith.constant 0 : index
    %c0_17 = arith.constant 0 : index
    %31 = vector.load %arg6[%c0_16, %c0_17] : memref<32x32xbf16, #tpu.memory_space<vmem>>, vector<32x32xbf16>
    %cst_18 = arith.constant dense<0.000000e+00> : vector<8x32xf32>
    %32 = tpu.matmul %26, %31, %cst_18 {dimension_numbers = #tpu.dot_dimension_numbers<[1], [0], [0], [1], [0, 0, 1, 1], [], []>} : vector<8x32xbf16>, vector<32x32xbf16>, vector<8x32xf32> -> vector<8x32xf32>
    %c0_19 = arith.constant 0 : index
    %c0_20 = arith.constant 0 : index
    %33 = vector.load %arg7[%c0_19, %c0_20] : memref<32x32xbf16, #tpu.memory_space<vmem>>, vector<32x32xbf16>
    %34 = tpu.iota {dimensions = array<i32: 0>} : vector<8x8xi32>
    %35 = tpu.iota {dimensions = array<i32: 1>} : vector<8x8xi32>
    %36 = arith.cmpi sle, %35, %34 : vector<8x8xi32>
    %cst_21 = arith.constant 0.000000e+00 : f32
    %37 = vector.broadcast %cst_21 : f32 to vector<8x32xf32>
    %38 = vector.extract_strided_slice %28 {offsets = [0, 0], sizes = [8, 8], strides = [1, 1]} : vector<8x32xf32> to vector<8x8xf32>
    %39 = arith.truncf %38 : vector<8x8xf32> to vector<8x8xbf16>
    %40 = vector.extract_strided_slice %30 {offsets = [0, 0], sizes = [8, 8], strides = [1, 1]} : vector<8x32xf32> to vector<8x8xf32>
    %41 = arith.truncf %40 : vector<8x8xf32> to vector<8x8xbf16>
    %42 = vector.extract_strided_slice %32 {offsets = [0, 0], sizes = [8, 8], strides = [1, 1]} : vector<8x32xf32> to vector<8x8xf32>
    %43 = arith.truncf %42 : vector<8x8xf32> to vector<8x8xbf16>
    %cst_22 = arith.constant dense<0.000000e+00> : vector<8x8xf32>
    %44 = tpu.matmul %39, %41, %cst_22 {dimension_numbers = #tpu.dot_dimension_numbers<[1], [1], [0], [0], [0, 0, 1, 0], [], []>} : vector<8x8xbf16>, vector<8x8xbf16>, vector<8x8xf32> -> vector<8x8xf32>
    %cst_23 = arith.constant 0.353553385 : f32
    %45 = vector.broadcast %cst_23 : f32 to vector<8x8xf32>
    %46 = arith.mulf %44, %45 : vector<8x8xf32>
    %cst_24 = arith.constant -1.000000e+30 : f32
    %47 = vector.broadcast %cst_24 : f32 to vector<8x8xf32>
    %48 = arith.select %36, %46, %47 : vector<8x8xi1>, vector<8x8xf32>
    %cst_25 = arith.constant dense<0xFF800000> : vector<8xf32>
    %49 = vector.multi_reduction <maximumf>, %48, %cst_25 [1] : vector<8x8xf32> to vector<8xf32>
    %50 = vector.shape_cast %49 : vector<8xf32> to vector<8x1xf32>
    %51 = vector.broadcast %50 : vector<8x1xf32> to vector<8x8xf32>
    %52 = arith.subf %48, %51 : vector<8x8xf32>
    %53 = math.exp %52 : vector<8x8xf32>
    %cst_26 = arith.constant dense<0.000000e+00> : vector<8xf32>
    %54 = vector.multi_reduction <add>, %53, %cst_26 [1] : vector<8x8xf32> to vector<8xf32>
    %55 = vector.shape_cast %54 : vector<8xf32> to vector<8x1xf32>
    %56 = vector.broadcast %55 : vector<8x1xf32> to vector<8x8xf32>
    %57 = arith.divf %53, %56 : vector<8x8xf32>
    %58 = arith.truncf %57 : vector<8x8xf32> to vector<8x8xbf16>
    %cst_27 = arith.constant dense<0.000000e+00> : vector<8x8xf32>
    %59 = tpu.matmul %58, %43, %cst_27 {dimension_numbers = #tpu.dot_dimension_numbers<[1], [0], [0], [1], [0, 0, 1, 1], [], []>} : vector<8x8xbf16>, vector<8x8xbf16>, vector<8x8xf32> -> vector<8x8xf32>
    %60 = arith.truncf %59 : vector<8x8xf32> to vector<8x8xbf16>
    %61 = vector.extract_strided_slice %33 {offsets = [0, 0], sizes = [8, 32], strides = [1, 1]} : vector<32x32xbf16> to vector<8x32xbf16>
    %cst_28 = arith.constant dense<0.000000e+00> : vector<8x32xf32>
    %62 = tpu.matmul %60, %61, %cst_28 {dimension_numbers = #tpu.dot_dimension_numbers<[1], [0], [0], [1], [0, 0, 1, 1], [], []>} : vector<8x8xbf16>, vector<8x32xbf16>, vector<8x32xf32> -> vector<8x32xf32>
    %63 = arith.addf %37, %62 : vector<8x32xf32>
    %64 = vector.extract_strided_slice %28 {offsets = [0, 8], sizes = [8, 8], strides = [1, 1]} : vector<8x32xf32> to vector<8x8xf32>
    %65 = arith.truncf %64 : vector<8x8xf32> to vector<8x8xbf16>
    %66 = vector.extract_strided_slice %30 {offsets = [0, 8], sizes = [8, 8], strides = [1, 1]} : vector<8x32xf32> to vector<8x8xf32>
    %67 = arith.truncf %66 : vector<8x8xf32> to vector<8x8xbf16>
    %68 = vector.extract_strided_slice %32 {offsets = [0, 8], sizes = [8, 8], strides = [1, 1]} : vector<8x32xf32> to vector<8x8xf32>
    %69 = arith.truncf %68 : vector<8x8xf32> to vector<8x8xbf16>
    %cst_29 = arith.constant dense<0.000000e+00> : vector<8x8xf32>
    %70 = tpu.matmul %65, %67, %cst_29 {dimension_numbers = #tpu.dot_dimension_numbers<[1], [1], [0], [0], [0, 0, 1, 0], [], []>} : vector<8x8xbf16>, vector<8x8xbf16>, vector<8x8xf32> -> vector<8x8xf32>
    %cst_30 = arith.constant 0.353553385 : f32
    %71 = vector.broadcast %cst_30 : f32 to vector<8x8xf32>
    %72 = arith.mulf %70, %71 : vector<8x8xf32>
    %cst_31 = arith.constant -1.000000e+30 : f32
    %73 = vector.broadcast %cst_31 : f32 to vector<8x8xf32>
    %74 = arith.select %36, %72, %73 : vector<8x8xi1>, vector<8x8xf32>
    %cst_32 = arith.constant dense<0xFF800000> : vector<8xf32>
    %75 = vector.multi_reduction <maximumf>, %74, %cst_32 [1] : vector<8x8xf32> to vector<8xf32>
    %76 = vector.shape_cast %75 : vector<8xf32> to vector<8x1xf32>
    %77 = vector.broadcast %76 : vector<8x1xf32> to vector<8x8xf32>
    %78 = arith.subf %74, %77 : vector<8x8xf32>
    %79 = math.exp %78 : vector<8x8xf32>
    %cst_33 = arith.constant dense<0.000000e+00> : vector<8xf32>
    %80 = vector.multi_reduction <add>, %79, %cst_33 [1] : vector<8x8xf32> to vector<8xf32>
    %81 = vector.shape_cast %80 : vector<8xf32> to vector<8x1xf32>
    %82 = vector.broadcast %81 : vector<8x1xf32> to vector<8x8xf32>
    %83 = arith.divf %79, %82 : vector<8x8xf32>
    %84 = arith.truncf %83 : vector<8x8xf32> to vector<8x8xbf16>
    %cst_34 = arith.constant dense<0.000000e+00> : vector<8x8xf32>
    %85 = tpu.matmul %84, %69, %cst_34 {dimension_numbers = #tpu.dot_dimension_numbers<[1], [0], [0], [1], [0, 0, 1, 1], [], []>} : vector<8x8xbf16>, vector<8x8xbf16>, vector<8x8xf32> -> vector<8x8xf32>
    %86 = arith.truncf %85 : vector<8x8xf32> to vector<8x8xbf16>
    %87 = vector.extract_strided_slice %33 {offsets = [8, 0], sizes = [8, 32], strides = [1, 1]} : vector<32x32xbf16> to vector<8x32xbf16>
    %cst_35 = arith.constant dense<0.000000e+00> : vector<8x32xf32>
    %88 = tpu.matmul %86, %87, %cst_35 {dimension_numbers = #tpu.dot_dimension_numbers<[1], [0], [0], [1], [0, 0, 1, 1], [], []>} : vector<8x8xbf16>, vector<8x32xbf16>, vector<8x32xf32> -> vector<8x32xf32>
    %89 = arith.addf %63, %88 : vector<8x32xf32>
    %90 = vector.extract_strided_slice %28 {offsets = [0, 16], sizes = [8, 8], strides = [1, 1]} : vector<8x32xf32> to vector<8x8xf32>
    %91 = arith.truncf %90 : vector<8x8xf32> to vector<8x8xbf16>
    %92 = vector.extract_strided_slice %30 {offsets = [0, 16], sizes = [8, 8], strides = [1, 1]} : vector<8x32xf32> to vector<8x8xf32>
    %93 = arith.truncf %92 : vector<8x8xf32> to vector<8x8xbf16>
    %94 = vector.extract_strided_slice %32 {offsets = [0, 16], sizes = [8, 8], strides = [1, 1]} : vector<8x32xf32> to vector<8x8xf32>
    %95 = arith.truncf %94 : vector<8x8xf32> to vector<8x8xbf16>
    %cst_36 = arith.constant dense<0.000000e+00> : vector<8x8xf32>
    %96 = tpu.matmul %91, %93, %cst_36 {dimension_numbers = #tpu.dot_dimension_numbers<[1], [1], [0], [0], [0, 0, 1, 0], [], []>} : vector<8x8xbf16>, vector<8x8xbf16>, vector<8x8xf32> -> vector<8x8xf32>
    %cst_37 = arith.constant 0.353553385 : f32
    %97 = vector.broadcast %cst_37 : f32 to vector<8x8xf32>
    %98 = arith.mulf %96, %97 : vector<8x8xf32>
    %cst_38 = arith.constant -1.000000e+30 : f32
    %99 = vector.broadcast %cst_38 : f32 to vector<8x8xf32>
    %100 = arith.select %36, %98, %99 : vector<8x8xi1>, vector<8x8xf32>
    %cst_39 = arith.constant dense<0xFF800000> : vector<8xf32>
    %101 = vector.multi_reduction <maximumf>, %100, %cst_39 [1] : vector<8x8xf32> to vector<8xf32>
    %102 = vector.shape_cast %101 : vector<8xf32> to vector<8x1xf32>
    %103 = vector.broadcast %102 : vector<8x1xf32> to vector<8x8xf32>
    %104 = arith.subf %100, %103 : vector<8x8xf32>
    %105 = math.exp %104 : vector<8x8xf32>
    %cst_40 = arith.constant dense<0.000000e+00> : vector<8xf32>
    %106 = vector.multi_reduction <add>, %105, %cst_40 [1] : vector<8x8xf32> to vector<8xf32>
    %107 = vector.shape_cast %106 : vector<8xf32> to vector<8x1xf32>
    %108 = vector.broadcast %107 : vector<8x1xf32> to vector<8x8xf32>
    %109 = arith.divf %105, %108 : vector<8x8xf32>
    %110 = arith.truncf %109 : vector<8x8xf32> to vector<8x8xbf16>
    %cst_41 = arith.constant dense<0.000000e+00> : vector<8x8xf32>
    %111 = tpu.matmul %110, %95, %cst_41 {dimension_numbers = #tpu.dot_dimension_numbers<[1], [0], [0], [1], [0, 0, 1, 1], [], []>} : vector<8x8xbf16>, vector<8x8xbf16>, vector<8x8xf32> -> vector<8x8xf32>
    %112 = arith.truncf %111 : vector<8x8xf32> to vector<8x8xbf16>
    %113 = vector.extract_strided_slice %33 {offsets = [16, 0], sizes = [8, 32], strides = [1, 1]} : vector<32x32xbf16> to vector<8x32xbf16>
    %cst_42 = arith.constant dense<0.000000e+00> : vector<8x32xf32>
    %114 = tpu.matmul %112, %113, %cst_42 {dimension_numbers = #tpu.dot_dimension_numbers<[1], [0], [0], [1], [0, 0, 1, 1], [], []>} : vector<8x8xbf16>, vector<8x32xbf16>, vector<8x32xf32> -> vector<8x32xf32>
    %115 = arith.addf %89, %114 : vector<8x32xf32>
    %116 = vector.extract_strided_slice %28 {offsets = [0, 24], sizes = [8, 8], strides = [1, 1]} : vector<8x32xf32> to vector<8x8xf32>
    %117 = arith.truncf %116 : vector<8x8xf32> to vector<8x8xbf16>
    %118 = vector.extract_strided_slice %30 {offsets = [0, 24], sizes = [8, 8], strides = [1, 1]} : vector<8x32xf32> to vector<8x8xf32>
    %119 = arith.truncf %118 : vector<8x8xf32> to vector<8x8xbf16>
    %120 = vector.extract_strided_slice %32 {offsets = [0, 24], sizes = [8, 8], strides = [1, 1]} : vector<8x32xf32> to vector<8x8xf32>
    %121 = arith.truncf %120 : vector<8x8xf32> to vector<8x8xbf16>
    %cst_43 = arith.constant dense<0.000000e+00> : vector<8x8xf32>
    %122 = tpu.matmul %117, %119, %cst_43 {dimension_numbers = #tpu.dot_dimension_numbers<[1], [1], [0], [0], [0, 0, 1, 0], [], []>} : vector<8x8xbf16>, vector<8x8xbf16>, vector<8x8xf32> -> vector<8x8xf32>
    %cst_44 = arith.constant 0.353553385 : f32
    %123 = vector.broadcast %cst_44 : f32 to vector<8x8xf32>
    %124 = arith.mulf %122, %123 : vector<8x8xf32>
    %cst_45 = arith.constant -1.000000e+30 : f32
    %125 = vector.broadcast %cst_45 : f32 to vector<8x8xf32>
    %126 = arith.select %36, %124, %125 : vector<8x8xi1>, vector<8x8xf32>
    %cst_46 = arith.constant dense<0xFF800000> : vector<8xf32>
    %127 = vector.multi_reduction <maximumf>, %126, %cst_46 [1] : vector<8x8xf32> to vector<8xf32>
    %128 = vector.shape_cast %127 : vector<8xf32> to vector<8x1xf32>
    %129 = vector.broadcast %128 : vector<8x1xf32> to vector<8x8xf32>
    %130 = arith.subf %126, %129 : vector<8x8xf32>
    %131 = math.exp %130 : vector<8x8xf32>
    %cst_47 = arith.constant dense<0.000000e+00> : vector<8xf32>
    %132 = vector.multi_reduction <add>, %131, %cst_47 [1] : vector<8x8xf32> to vector<8xf32>
    %133 = vector.shape_cast %132 : vector<8xf32> to vector<8x1xf32>
    %134 = vector.broadcast %133 : vector<8x1xf32> to vector<8x8xf32>
    %135 = arith.divf %131, %134 : vector<8x8xf32>
    %136 = arith.truncf %135 : vector<8x8xf32> to vector<8x8xbf16>
    %cst_48 = arith.constant dense<0.000000e+00> : vector<8x8xf32>
    %137 = tpu.matmul %136, %121, %cst_48 {dimension_numbers = #tpu.dot_dimension_numbers<[1], [0], [0], [1], [0, 0, 1, 1], [], []>} : vector<8x8xbf16>, vector<8x8xbf16>, vector<8x8xf32> -> vector<8x8xf32>
    %138 = arith.truncf %137 : vector<8x8xf32> to vector<8x8xbf16>
    %139 = vector.extract_strided_slice %33 {offsets = [24, 0], sizes = [8, 32], strides = [1, 1]} : vector<32x32xbf16> to vector<8x32xbf16>
    %cst_49 = arith.constant dense<0.000000e+00> : vector<8x32xf32>
    %140 = tpu.matmul %138, %139, %cst_49 {dimension_numbers = #tpu.dot_dimension_numbers<[1], [0], [0], [1], [0, 0, 1, 1], [], []>} : vector<8x8xbf16>, vector<8x32xbf16>, vector<8x32xf32> -> vector<8x32xf32>
    %141 = arith.addf %115, %140 : vector<8x32xf32>
    %c0_50 = arith.constant 0 : index
    %c0_51 = arith.constant 0 : index
    %142 = vector.load %arg8[%c0_50, %c0_51] : memref<1x32xf32, #tpu.memory_space<vmem>>, vector<1x32xf32>
    %143 = vector.broadcast %142 : vector<1x32xf32> to vector<8x32xf32>
    %144 = arith.addf %141, %143 : vector<8x32xf32>
    %145 = arith.addf %1, %144 : vector<8x32xf32>
    %c0_52 = arith.constant 0 : index
    %c0_53 = arith.constant 0 : index
    %146 = vector.load %arg9[%c0_52, %c0_53] : memref<1x32xf32, #tpu.memory_space<vmem>>, vector<1x32xf32>
    %c0_54 = arith.constant 0 : index
    %c0_55 = arith.constant 0 : index
    %147 = vector.load %arg10[%c0_54, %c0_55] : memref<1x32xf32, #tpu.memory_space<vmem>>, vector<1x32xf32>
    %cst_56 = arith.constant dense<0.000000e+00> : vector<8xf32>
    %148 = vector.multi_reduction <add>, %145, %cst_56 [1] : vector<8x32xf32> to vector<8xf32>
    %149 = vector.shape_cast %148 : vector<8xf32> to vector<8x1xf32>
    %cst_57 = arith.constant 3.200000e+01 : f32
    %150 = vector.broadcast %cst_57 : f32 to vector<8x1xf32>
    %151 = arith.divf %149, %150 : vector<8x1xf32>
    %152 = vector.broadcast %151 : vector<8x1xf32> to vector<8x32xf32>
    %153 = arith.subf %145, %152 : vector<8x32xf32>
    %154 = arith.mulf %153, %153 : vector<8x32xf32>
    %cst_58 = arith.constant dense<0.000000e+00> : vector<8xf32>
    %155 = vector.multi_reduction <add>, %154, %cst_58 [1] : vector<8x32xf32> to vector<8xf32>
    %156 = vector.shape_cast %155 : vector<8xf32> to vector<8x1xf32>
    %cst_59 = arith.constant 3.200000e+01 : f32
    %157 = vector.broadcast %cst_59 : f32 to vector<8x1xf32>
    %158 = arith.divf %156, %157 : vector<8x1xf32>
    %159 = vector.broadcast %151 : vector<8x1xf32> to vector<8x32xf32>
    %160 = arith.subf %145, %159 : vector<8x32xf32>
    %cst_60 = arith.constant 9.99999974E-6 : f32
    %161 = vector.broadcast %cst_60 : f32 to vector<8x1xf32>
    %162 = arith.addf %158, %161 : vector<8x1xf32>
    %163 = math.rsqrt %162 : vector<8x1xf32>
    %164 = vector.broadcast %163 : vector<8x1xf32> to vector<8x32xf32>
    %165 = arith.mulf %160, %164 : vector<8x32xf32>
    %166 = vector.broadcast %146 : vector<1x32xf32> to vector<8x32xf32>
    %167 = arith.mulf %165, %166 : vector<8x32xf32>
    %168 = vector.broadcast %147 : vector<1x32xf32> to vector<8x32xf32>
    %169 = arith.addf %167, %168 : vector<8x32xf32>
    %170 = arith.truncf %169 : vector<8x32xf32> to vector<8x32xbf16>
    %c0_61 = arith.constant 0 : index
    %c0_62 = arith.constant 0 : index
    %171 = vector.load %arg11[%c0_61, %c0_62] : memref<32x128xbf16, #tpu.memory_space<vmem>>, vector<32x128xbf16>
    %cst_63 = arith.constant dense<0.000000e+00> : vector<8x128xf32>
    %172 = tpu.matmul %170, %171, %cst_63 {dimension_numbers = #tpu.dot_dimension_numbers<[1], [0], [0], [1], [0, 0, 1, 1], [], []>} : vector<8x32xbf16>, vector<32x128xbf16>, vector<8x128xf32> -> vector<8x128xf32>
    %c0_64 = arith.constant 0 : index
    %c0_65 = arith.constant 0 : index
    %173 = vector.load %arg12[%c0_64, %c0_65] : memref<1x128xf32, #tpu.memory_space<vmem>>, vector<1x128xf32>
    %174 = vector.broadcast %173 : vector<1x128xf32> to vector<8x128xf32>
    %175 = arith.addf %172, %174 : vector<8x128xf32>
    %cst_66 = arith.constant 0.000000e+00 : f32
    %176 = vector.broadcast %cst_66 : f32 to vector<8x128xf32>
    %177 = arith.maximumf %175, %176 : vector<8x128xf32>
    %178 = arith.truncf %177 : vector<8x128xf32> to vector<8x128xbf16>
    %c0_67 = arith.constant 0 : index
    %c0_68 = arith.constant 0 : index
    %179 = vector.load %arg13[%c0_67, %c0_68] : memref<128x32xbf16, #tpu.memory_space<vmem>>, vector<128x32xbf16>
    %cst_69 = arith.constant dense<0.000000e+00> : vector<8x32xf32>
    %180 = tpu.matmul %178, %179, %cst_69 {dimension_numbers = #tpu.dot_dimension_numbers<[1], [0], [0], [1], [0, 0, 1, 1], [], []>} : vector<8x128xbf16>, vector<128x32xbf16>, vector<8x32xf32> -> vector<8x32xf32>
    %c0_70 = arith.constant 0 : index
    %c0_71 = arith.constant 0 : index
    %181 = vector.load %arg14[%c0_70, %c0_71] : memref<1x32xf32, #tpu.memory_space<vmem>>, vector<1x32xf32>
    %182 = vector.broadcast %181 : vector<1x32xf32> to vector<8x32xf32>
    %183 = arith.addf %180, %182 : vector<8x32xf32>
    %184 = arith.addf %145, %183 : vector<8x32xf32>
    %c0_72 = arith.constant 0 : index
    %c0_73 = arith.constant 0 : index
    %c0_74 = arith.constant 0 : index
    %185 = vector.load %arg15[%c0_72, %c0_73, %c0_74] : memref<1x8x32xf32, #tpu.memory_space<vmem>>, vector<1x8x32xf32>
    %186 = vector.shape_cast %185 : vector<1x8x32xf32> to vector<8x32xf32>
    %187 = vector.shape_cast %184 : vector<8x32xf32> to vector<1x8x32xf32>
    tpu.vector_store %arg15[%c0_72, %c0_73, %c0_74], %187 {strides = array<i32>} : memref<1x8x32xf32, #tpu.memory_space<vmem>>, vector<1x8x32xf32>,
    return
  }
  func.func @transform_0(%arg0: i32) -> (i32, i32, i32) {
    %c0_i32 = arith.constant 0 : i32
    %c0_i32_0 = arith.constant 0 : i32
    %c0_i32_1 = arith.constant 0 : i32
    return %arg0, %c0_i32, %c0_i32_0 : i32, i32, i32
  }
  func.func @transform_1(%arg0: i32) -> (i32, i32) {
    %c0_i32 = arith.constant 0 : i32
    %c0_i32_0 = arith.constant 0 : i32
    %c0_i32_1 = arith.constant 0 : i32
    return %c0_i32, %c0_i32_0 : i32, i32
  }
  func.func @transform_2(%arg0: i32) -> (i32, i32) {
    %c0_i32 = arith.constant 0 : i32
    %c0_i32_0 = arith.constant 0 : i32
    %c0_i32_1 = arith.constant 0 : i32
    return %c0_i32, %c0_i32_0 : i32, i32
  }
  func.func @transform_3(%arg0: i32) -> (i32, i32) {
    %c0_i32 = arith.constant 0 : i32
    %c0_i32_0 = arith.constant 0 : i32
    %c0_i32_1 = arith.constant 0 : i32
    return %c0_i32, %c0_i32_0 : i32, i32
  }
  func.func @transform_4(%arg0: i32) -> (i32, i32) {
    %c0_i32 = arith.constant 0 : i32
    %c0_i32_0 = arith.constant 0 : i32
    %c0_i32_1 = arith.constant 0 : i32
    return %c0_i32, %c0_i32_0 : i32, i32
  }
  func.func @transform_5(%arg0: i32) -> (i32, i32) {
    %c0_i32 = arith.constant 0 : i32
    %c0_i32_0 = arith.constant 0 : i32
    %c0_i32_1 = arith.constant 0 : i32
    return %c0_i32, %c0_i32_0 : i32, i32
  }
  func.func @transform_6(%arg0: i32) -> (i32, i32) {
    %c0_i32 = arith.constant 0 : i32
    %c0_i32_0 = arith.constant 0 : i32
    %c0_i32_1 = arith.constant 0 : i32
    return %c0_i32, %c0_i32_0 : i32, i32
  }
  func.func @transform_7(%arg0: i32) -> (i32, i32) {
    %c0_i32 = arith.constant 0 : i32
    %c0_i32_0 = arith.constant 0 : i32
    %c0_i32_1 = arith.constant 0 : i32
    return %c0_i32, %c0_i32_0 : i32, i32
  }
  func.func @transform_8(%arg0: i32) -> (i32, i32) {
    %c0_i32 = arith.constant 0 : i32
    %c0_i32_0 = arith.constant 0 : i32
    %c0_i32_1 = arith.constant 0 : i32
    return %c0_i32, %c0_i32_0 : i32, i32
  }
  func.func @transform_9(%arg0: i32) -> (i32, i32) {
    %c0_i32 = arith.constant 0 : i32
    %c0_i32_0 = arith.constant 0 : i32
    %c0_i32_1 = arith.constant 0 : i32
    return %c0_i32, %c0_i32_0 : i32, i32
  }
  func.func @transform_10(%arg0: i32) -> (i32, i32) {
    %c0_i32 = arith.constant 0 : i32
    %c0_i32_0 = arith.constant 0 : i32
    %c0_i32_1 = arith.constant 0 : i32
    return %c0_i32, %c0_i32_0 : i32, i32
  }
  func.func @transform_11(%arg0: i32) -> (i32, i32) {
    %c0_i32 = arith.constant 0 : i32
    %c0_i32_0 = arith.constant 0 : i32
    %c0_i32_1 = arith.constant 0 : i32
    return %c0_i32, %c0_i32_0 : i32, i32
  }
  func.func @transform_12(%arg0: i32) -> (i32, i32) {
    %c0_i32 = arith.constant 0 : i32
    %c0_i32_0 = arith.constant 0 : i32
    %c0_i32_1 = arith.constant 0 : i32
    return %c0_i32, %c0_i32_0 : i32, i32
  }
  func.func @transform_13(%arg0: i32) -> (i32, i32) {
    %c0_i32 = arith.constant 0 : i32
    %c0_i32_0 = arith.constant 0 : i32
    %c0_i32_1 = arith.constant 0 : i32
    return %c0_i32, %c0_i32_0 : i32, i32
  }
  func.func @transform_14(%arg0: i32) -> (i32, i32, i32) {
    %c0_i32 = arith.constant 0 : i32
    %c0_i32_0 = arith.constant 0 : i32
    %c0_i32_1 = arith.constant 0 : i32
    return %arg0, %c0_i32, %c0_i32_0 : i32, i32, i32
  }
}

module attributes {stable_mosaic.version = 11 : i64} {
  func.func @kernel(%arg0: i32, %arg1: memref<16x32xf32, #tpu.memory_space<vmem>>, %arg2: memref<1x32xf32, #tpu.memory_space<vmem>>, %arg3: memref<1x32xf32, #tpu.memory_space<vmem>>, %arg4: memref<32x128xbf16, #tpu.memory_space<vmem>>, %arg5: memref<1x128xf32, #tpu.memory_space<vmem>>, %arg6: memref<16x128xf32, #tpu.memory_space<vmem>>) attributes {dimension_semantics = [#tpu.dimension_semantics<parallel>], iteration_bounds = array<i64: 1>, scalar_prefetch = 0 : i64, scratch_operands = 0 : i64, tpu.core_type = #tpu.core_type<tc>, window_params = [{transform_indices = @transform_0, window_bounds = array<i64: 16, 32>}, {pipeline_mode = #tpu.pipeline_mode<synchronous>, transform_indices = @transform_1, window_bounds = array<i64: 1, 32>}, {pipeline_mode = #tpu.pipeline_mode<synchronous>, transform_indices = @transform_2, window_bounds = array<i64: 1, 32>}, {pipeline_mode = #tpu.pipeline_mode<synchronous>, transform_indices = @transform_3, window_bounds = array<i64: 32, 128>}, {pipeline_mode = #tpu.pipeline_mode<synchronous>, transform_indices = @transform_4, window_bounds = array<i64: 1, 128>}, {transform_indices = @transform_5, window_bounds = array<i64: 16, 128>}]} {
    %c0 = arith.constant 0 : index
    %c0_0 = arith.constant 0 : index
    %0 = vector.load %arg1[%c0, %c0_0] : memref<16x32xf32, #tpu.memory_space<vmem>>, vector<16x32xf32>
    %c0_1 = arith.constant 0 : index
    %c0_2 = arith.constant 0 : index
    %1 = vector.load %arg2[%c0_1, %c0_2] : memref<1x32xf32, #tpu.memory_space<vmem>>, vector<1x32xf32>
    %c0_3 = arith.constant 0 : index
    %c0_4 = arith.constant 0 : index
    %2 = vector.load %arg3[%c0_3, %c0_4] : memref<1x32xf32, #tpu.memory_space<vmem>>, vector<1x32xf32>
    %cst = arith.constant dense<0.000000e+00> : vector<16xf32>
    %3 = vector.multi_reduction <add>, %0, %cst [1] : vector<16x32xf32> to vector<16xf32>
    %4 = vector.shape_cast %3 : vector<16xf32> to vector<16x1xf32>
    %cst_5 = arith.constant 3.200000e+01 : f32
    %5 = vector.broadcast %cst_5 : f32 to vector<16x1xf32>
    %6 = arith.divf %4, %5 : vector<16x1xf32>
    %7 = vector.broadcast %6 : vector<16x1xf32> to vector<16x32xf32>
    %8 = arith.subf %0, %7 : vector<16x32xf32>
    %9 = arith.mulf %8, %8 : vector<16x32xf32>
    %cst_6 = arith.constant dense<0.000000e+00> : vector<16xf32>
    %10 = vector.multi_reduction <add>, %9, %cst_6 [1] : vector<16x32xf32> to vector<16xf32>
    %11 = vector.shape_cast %10 : vector<16xf32> to vector<16x1xf32>
    %cst_7 = arith.constant 3.200000e+01 : f32
    %12 = vector.broadcast %cst_7 : f32 to vector<16x1xf32>
    %13 = arith.divf %11, %12 : vector<16x1xf32>
    %14 = vector.broadcast %6 : vector<16x1xf32> to vector<16x32xf32>
    %15 = arith.subf %0, %14 : vector<16x32xf32>
    %cst_8 = arith.constant 9.99999974E-6 : f32
    %16 = vector.broadcast %cst_8 : f32 to vector<16x1xf32>
    %17 = arith.addf %13, %16 : vector<16x1xf32>
    %18 = math.rsqrt %17 : vector<16x1xf32>
    %19 = vector.broadcast %18 : vector<16x1xf32> to vector<16x32xf32>
    %20 = arith.mulf %15, %19 : vector<16x32xf32>
    %21 = vector.broadcast %1 : vector<1x32xf32> to vector<16x32xf32>
    %22 = arith.mulf %20, %21 : vector<16x32xf32>
    %23 = vector.broadcast %2 : vector<1x32xf32> to vector<16x32xf32>
    %24 = arith.addf %22, %23 : vector<16x32xf32>
    %25 = arith.truncf %24 : vector<16x32xf32> to vector<16x32xbf16>
    %c0_9 = arith.constant 0 : index
    %c0_10 = arith.constant 0 : index
    %26 = vector.load %arg4[%c0_9, %c0_10] : memref<32x128xbf16, #tpu.memory_space<vmem>>, vector<32x128xbf16>
    %cst_11 = arith.constant dense<0.000000e+00> : vector<16x128xf32>
    %27 = tpu.matmul %25, %26, %cst_11 {dimension_numbers = #tpu.dot_dimension_numbers<[1], [0], [0], [1], [0, 0, 1, 1], [], []>} : vector<16x32xbf16>, vector<32x128xbf16>, vector<16x128xf32> -> vector<16x128xf32>
    %c0_12 = arith.constant 0 : index
    %c0_13 = arith.constant 0 : index
    %28 = vector.load %arg5[%c0_12, %c0_13] : memref<1x128xf32, #tpu.memory_space<vmem>>, vector<1x128xf32>
    %29 = vector.broadcast %28 : vector<1x128xf32> to vector<16x128xf32>
    %30 = arith.addf %27, %29 : vector<16x128xf32>
    %c0_14 = arith.constant 0 : index
    %c0_15 = arith.constant 0 : index
    %31 = vector.load %arg6[%c0_14, %c0_15] : memref<16x128xf32, #tpu.memory_space<vmem>>, vector<16x128xf32>
    tpu.vector_store %arg6[%c0_14, %c0_15], %30 {strides = array<i32>} : memref<16x128xf32, #tpu.memory_space<vmem>>, vector<16x128xf32>,
    return
  }
  func.func @transform_0(%arg0: i32) -> (i32, i32) {
    %c0_i32 = arith.constant 0 : i32
    %c0_i32_0 = arith.constant 0 : i32
    return %arg0, %c0_i32 : i32, i32
  }
  func.func @transform_1(%arg0: i32) -> (i32, i32) {
    %c0_i32 = arith.constant 0 : i32
    %c0_i32_0 = arith.constant 0 : i32
    %c0_i32_1 = arith.constant 0 : i32
    return %c0_i32, %c0_i32_0 : i32, i32
  }
  func.func @transform_2(%arg0: i32) -> (i32, i32) {
    %c0_i32 = arith.constant 0 : i32
    %c0_i32_0 = arith.constant 0 : i32
    %c0_i32_1 = arith.constant 0 : i32
    return %c0_i32, %c0_i32_0 : i32, i32
  }
  func.func @transform_3(%arg0: i32) -> (i32, i32) {
    %c0_i32 = arith.constant 0 : i32
    %c0_i32_0 = arith.constant 0 : i32
    %c0_i32_1 = arith.constant 0 : i32
    return %c0_i32, %c0_i32_0 : i32, i32
  }
  func.func @transform_4(%arg0: i32) -> (i32, i32) {
    %c0_i32 = arith.constant 0 : i32
    %c0_i32_0 = arith.constant 0 : i32
    %c0_i32_1 = arith.constant 0 : i32
    return %c0_i32, %c0_i32_0 : i32, i32
  }
  func.func @transform_5(%arg0: i32) -> (i32, i32) {
    %c0_i32 = arith.constant 0 : i32
    %c0_i32_0 = arith.constant 0 : i32
    return %arg0, %c0_i32 : i32, i32
  }
}

</mosaic_0001>

<bundles_post_ra>
// kernel: bigram_lm_forward.4
= control target key start
LH: loop header
LB: loop body
LE: loop exit
PB: predicated region body
PF: predicated region fallthrough
CT: control target
= control target key end

     0   :  { %s418_s12 = smov 0   ;;  %s472_s0 = inlined_call_operand.vmem [shape: s32[2,8,1], index: 0, kind: input, shape index: {}]   ;;  %s473_s1 = inlined_call_operand.vmem [shape: f32[65,32], index: 1, kind: input, shape index: {}]   ;;  %s474_s2 = inlined_call_operand.vmem [shape: f32[8,32], index: 2, kind: input, shape index: {}]   ;;  %s475_s3 = inlined_call_operand.vmem [shape: f32[2,8,32], index: 3, kind: output, shape index: {}]  }
   0x1 LB: > { %s318_s13 = sadd.s32 4294967295, %s392_s12   ;;  %p322_p0 = scmp.ge.s32.totalorder %s392_s12, 1  ;;  %s392_s12 = sphi %s418_s12, %s13_s12  }
   0x2   : > { %p136_p1 = scmp.lt.s32.totalorder %s392_s12, 3 }
   0x4   : > { %p137_p2 = pnand %p322_p0, %p136_p1 }
   0x5   : > { %p158_p3 = scmp.lt.s32.totalorder (!%p137_p2), %s318_s13, 1  ;;  %v175_v0 = vld [vmem:[%s473_s1] sm:$0xff] (!%p137_p2)  ;;  %v176_v1 = vld [vmem:[%s473_s1 + $0x8] sm:$0xff] (!%p137_p2)  ;;  %v177_v2 = vld [vmem:[%s473_s1 + $0x10] sm:$0xff] (!%p137_p2)  ;;  %v394_v3 = vmov (!%p137_p2), 0   ;;  %v395_v4 = vmov (!%p137_p2), 0.0|0.0   ;;  %v167_v17 = vlaneseq (!%p137_p2) }
   0x6   : > { %140 = sbr.rel (%p137_p2) target bundleno = 362 (0x16a), region = 32  ;;  %385 = vset.pattern.permute.xlu0 (!%p137_p2), %v394_v3  ;;  %361 = vmatprep.subr.bf16.mxu0 (!%p137_p2), %v395_v4  ;;  %v362_v5 = vpack.c.bf16 (!%p137_p2), %v176_v1, %v175_v0  ;;  %v178_v6 = vld [vmem:[%s473_s1 + $0x18] sm:$0xff] (!%p137_p2)  ;;  %v179_v8 = vld [vmem:[%s473_s1 + $0x20] sm:$0xff] (!%p137_p2)  ;;  %v180_v9 = vld [vmem:[%s473_s1 + $0x28] sm:$0xff] (!%p137_p2)  ;;  %vm396_vm0 = vmmov (!%p137_p2), 0   ;;  %v397_v14 = vmov (!%p137_p2), 0.0  }
   0x7   : > { %v365_v7 = vpack.c.bf16 (!%p137_p2), %v178_v6, %v177_v2  ;;  %v368_v11 = vpack.c.bf16 (!%p137_p2), %v180_v9, %v179_v8  ;;  %v181_v12 = vld [vmem:[%s473_s1 + $0x30] sm:$0xff] (!%p137_p2)  ;;  %v182_v13 = vld [vmem:[%s473_s1 + $0x38] sm:$0xff] (!%p137_p2)  ;;  %358 = vmatprep.mubr.msk.f32.mxu0 (!%p137_p2), %vm396_vm0, %v397_v14  ;;  %v183_v16 = vld [vmem:[%s473_s1 + $0x40] sm:$0x1] (!%p137_p2)  ;;  %vm189_vm1 = vcmask (!%p137_p2), 1040384   ;;  %v168_v18 = vand.u32 (!%p137_p2), 127, %v167_v17 }
   0x8   : > { %363 = vmatpush3.bf16.msra.mxu0 (!%p137_p2), %v362_v5  ;;  %v371_v15 = vpack.c.bf16 (!%p137_p2), %v182_v13, %v181_v12  ;;  %vm185_vm2 = vcmask (!%p137_p2), 531456   ;;  %v184_v21 = vld [vmem:[%s474_s2] sm:$0xff] (!%p137_p2)  ;;  %vm263_vm4 = vcmask (!%p137_p2), 261120  }
   0x9   : > { %364 = vmatprep.subr.bf16.mxu0 (!%p137_p2), %v395_v4 }
   0xc   : > { %366 = vmatpush3.bf16.msra.mxu0 (!%p137_p2), %v365_v7 }
   0xd   : > { %s477_s13 = smov (!%p158_p3, %s318_s13), 1  ;;  %367 = vmatprep.subr.bf16.mxu0 %v395_v4 }
   0xe   : > { %s323_s22 = sshll.u32 %s477_s13, 3 }
   0xf   : > { %s161_s29 = scalar_lea.vmem %s472_s0, %s323_s22  ;;  %s165_s15 = scalar_lea.vmem %s475_s3, %s323_s22 }
  0x10   : > { %v166_v10 = vld [vmem:[%s161_s29] sm:$0xff]  ;;  %369 = vmatpush3.bf16.msra.mxu0 %v368_v11 }
  0x11   : > { %170 = vperm.xlu0 %385, %v166_v10   ;;  %370 = vmatprep.subr.bf16.mxu0 %v395_v4 }
  0x14   : > { %372 = vmatpush3.bf16.msra.mxu0 %v371_v15 }
  0x15   : > { %356 = vmatprep.subr.mxu0 %v397_v14 }
  0x18   : > { %357 = vmatpush3.msk.msra.mxu0 %vm189_vm1, %v183_v16 }
  0x90   : > { %v171_v19 = vpop.permute.xlu0 %170 }
  0x91   : > { %vm172_vm3 = vcmp.eq.s32.totalorder %v168_v18, %v171_v19 }
  0x92   : > { %v325_v20 = vsel %vm172_vm3, 1.0, %v397_v14 }
  0x93   : > { %359 = vmatmul.mubr.msk.f32.vlgmr.msra.gmra.mrb[0].mxu0 %vm185_vm2, %v325_v20 }
 0x166   : > { %v259_v22 = vpop.f32.mrb[0].mxu0 }
 0x167   : > { %v260_v23 = vadd.f32 %v259_v22, %v184_v21  ;;  %v360_v24 = vpop.f32.mrb[1].mxu0 }
 0x169   : > { %264 = vst.msk [vmem:[%s165_s15] sm:$0xff] %vm263_vm4, %v260_v23 }
 0x16a PF: > { %s13_s12 = sadd.s32 1, %s392_s12  }
 0x16b   : > { %p10_p4 = scmp.ge.s32.totalorder %s13_s12, 4  }
 0x16d   :  { %12 = sbr.rel (!%p10_p4) target bundleno = 1 (0x1), region = 62 }

// kernel: bigram_lm_forward.7
= control target key start
LH: loop header
LB: loop body
LE: loop exit
PB: predicated region body
PF: predicated region fallthrough
CT: control target
= control target key end

     0   :  { %vm25_vm0 = vcmask 261120   ;;  %v168_v15 = vmov 0.0   ;;  %vm169_vm1 = vmmov 0   ;;  %s232_s0 = inlined_call_operand.vmem [shape: f32[16,32], index: 0, kind: input, shape index: {}]   ;;  %s233_s3 = inlined_call_operand.vmem [shape: bf16[32,128], index: 3, kind: input, shape index: {}]   ;;  %s234_s1 = inlined_call_operand.vmem [shape: f32[1,32], index: 1, kind: input, shape index: {}]   ;;  %s235_s2 = inlined_call_operand.vmem [shape: f32[1,32], index: 2, kind: input, shape index: {}]   ;;  %s236_s4 = inlined_call_operand.vmem [shape: f32[1,128], index: 4, kind: input, shape index: {}]   ;;  %s237_s5 = inlined_call_operand.vmem [shape: f32[16,128], index: 5, kind: output, shape index: {}]  }
   0x1   :  { %v21_v0 = vld [vmem:[%s232_s0] sm:$0xff]  ;;  %v22_v1 = vld [vmem:[%s232_s0 + $0x8] sm:$0xff]  ;;  %152 = vmatprep.subr.bf16.mxu0 %v168_v15  ;;  %156 = vmatprep.mubr.msk.bf16.mxu0 %vm169_vm1, %v168_v15 }
   0x2   :  { %v26_v2 = vsel %vm25_vm0, %v21_v0, 0.0  ;;  %v29_v3 = vsel %vm25_vm0, %v22_v1, 0.0  ;;  %v162_v14 = vld [vmem:[%s233_s3] sm:$0xff]   ;;  %v163_v16 = vld [vmem:[%s233_s3 + $0x8] sm:$0xff]  }
   0x3   :  { %27 = vadd.xlane.f32.xlu0 %v26_v2  ;;  %153 = vmatpush3.bf16.msra.mxu0 %v162_v14  ;;  %v143_v25 = vld [vmem:[%s234_s1] ss:$0 sm:$0xff] }
   0x4   :  { %154 = vmatprep.subr.bf16.mxu0 %v168_v15  ;;  %v144_v29 = vld [vmem:[%s235_s2] ss:$0 sm:$0xff] }
   0x5   :  { %v145_v34 = vld [vmem:[%s236_s4] ss:$0 sm:$0xff] }
   0x7   :  { %30 = vadd.xlane.f32.xlu0 %v29_v3  ;;  %155 = vmatpush3.bf16.msra.mxu0 %v163_v16 }
  0x90   :  { %v28_v4 = vpop.xlane.xlu0 %27 }
  0x91   :  { %v33_v5 = vmul.f32 0.03125, %v28_v4 }
  0x93   :  { %v35_v6 = vsub.f32 %v21_v0, %v33_v5 }
  0x94   :  { %v31_v7 = vpop.xlane.xlu0 %30 }
  0x95   :  { %v34_v8 = vmul.f32 0.03125, %v31_v7  ;;  %v37_v9 = vmul.f32 %v35_v6, %v35_v6 }
  0x97   :  { %v36_v10 = vsub.f32 %v22_v1, %v34_v8  ;;  %v39_v11 = vsel %vm25_vm0, %v37_v9, 0.0 }
  0x98   :  { %40 = vadd.xlane.f32.xlu1 %v39_v11 }
  0x99   :  { %v38_v12 = vmul.f32 %v36_v10, %v36_v10 }
  0x9b   :  { %v42_v13 = vsel %vm25_vm0, %v38_v12, 0.0 }
  0x9c   :  { %43 = vadd.xlane.f32.xlu1 %v42_v13 }
 0x125   :  { %v41_v17 = vpop.xlane.xlu1 %40 }
 0x126   :  { %v45_v18 = vmul.f32 0.03125, %v41_v17 }
 0x128   :  { %v47_v19 = vadd.f32 1e-05, %v45_v18 }
 0x129   :  { %v44_v20 = vpop.xlane.xlu1 %43 }
 0x12a   :  { %164 = vrsqrt.f32 %v47_v19  ;;  %v46_v21 = vmul.f32 0.03125, %v44_v20 }
 0x12c   :  { %v48_v22 = vadd.f32 1e-05, %v46_v21 }
 0x12e   :  { %166 = vrsqrt.f32 %v48_v22 }
 0x134   :  { %v165_v23 = vpop.eup %164 }
 0x135   :  { %v51_v24 = vmul.f32 %v165_v23, %v35_v6 }
 0x137   :  { %v59_v28 = vmul.f32 %v143_v25, %v51_v24 }
 0x138   :  { %v167_v26 = vpop.eup %166 }
 0x139   :  { %v52_v27 = vmul.f32 %v167_v26, %v36_v10  ;;  %v67_v31 = vadd.f32 %v144_v29, %v59_v28 }
 0x13b   :  { %v60_v30 = vmul.f32 %v143_v25, %v52_v27 }
 0x13d   :  { %v68_v32 = vadd.f32 %v144_v29, %v60_v30 }
 0x13f   :  { %v69_v33 = vpack.c.bf16 %v68_v32, %v67_v31 }
 0x141   :  { %157 = vmatmul.mubr.msk.bf16.vlgmr.msra.gmra.mrb[0].mxu0 %vm25_vm0, %v69_v33 }
 0x214   :  { %v130_v35 = vpop.f32.mrb[0].mxu0 }
 0x215   :  { %v131_v36 = vadd.f32 %v145_v34, %v130_v35  ;;  %v158_v37 = vpop.f32.mrb[1].mxu0 }
 0x216   :  { %v133_v38 = vpop.f32.mrb[2].mxu0 }
 0x217   :  { %137 = vst [vmem:[%s237_s5] sm:$0xff] %v131_v36  ;;  %v134_v39 = vadd.f32 %v145_v34, %v133_v38  ;;  %v159_v40 = vpop.f32.mrb[3].mxu0 }
 0x219   :  { %138 = vst [vmem:[%s237_s5 + $0x8] sm:$0xff] %v134_v39 }

// kernel: bigram_lm_forward.5
= control target key start
LH: loop header
LB: loop body
LE: loop exit
PB: predicated region body
PF: predicated region fallthrough
CT: control target
= control target key end

     0   :  { %s1944_s29 = smov 0   ;;  %s2210_s0 = inlined_call_operand.vmem [shape: f32[2,8,32], index: 0, kind: input, shape index: {}]   ;;  %s2211_s1 = inlined_call_operand.vmem [shape: f32[1,32], index: 1, kind: input, shape index: {}]   ;;  %s2212_s2 = inlined_call_operand.vmem [shape: f32[1,32], index: 2, kind: input, shape index: {}]   ;;  %s2213_s3 = inlined_call_operand.vmem [shape: bf16[32,32], index: 3, kind: input, shape index: {}]   ;;  %s2214_s4 = inlined_call_operand.vmem [shape: bf16[32,32], index: 4, kind: input, shape index: {}]   ;;  %s2215_s5 = inlined_call_operand.vmem [shape: bf16[32,32], index: 5, kind: input, shape index: {}]   ;;  %s2216_s6 = inlined_call_operand.vmem [shape: bf16[32,32], index: 6, kind: input, shape index: {}]   ;;  %s2217_s7 = inlined_call_operand.vmem [shape: f32[1,32], index: 7, kind: input, shape index: {}]   ;;  %s2218_s8 = inlined_call_operand.vmem [shape: f32[1,32], index: 8, kind: input, shape index: {}]   ;;  %s2219_s9 = inlined_call_operand.vmem [shape: f32[1,32], index: 9, kind: input, shape index: {}]   ;;  %s2220_s10 = inlined_call_operand.vmem [shape: bf16[32,128], index: 10, kind: input, shape index: {}]   ;;  %s2221_s11 = inlined_call_operand.vmem [shape: f32[1,128], index: 11, kind: input, shape index: {}]   ;;  %s2222_s12 = inlined_call_operand.vmem [shape: bf16[128,32], index: 12, kind: input, shape index: {}]   ;;  %s2223_s13 = inlined_call_operand.vmem [shape: f32[1,32], index: 13, kind: input, shape index: {}]   ;;  %s2224_s14 = inlined_call_operand.vmem [shape: f32[2,8,32], index: 14, kind: output, shape index: {}]  }
   0x1 LB: > { %s1590_s30 = sadd.s32 4294967295, %s1862_s29   ;;  %p1594_p0 = scmp.ge.s32.totalorder %s1862_s29, 1  ;;  %s1862_s29 = sphi %s1944_s29, %s24_s29  }
   0x2   : > { %p411_p1 = scmp.lt.s32.totalorder %s1862_s29, 3 }
   0x4   : > { %p412_p2 = pnand %p1594_p0, %p411_p1 }
   0x5   : > { %p455_p3 = scmp.lt.s32.totalorder (!%p412_p2), %s1590_s30, 1  ;;  %vm467_vm0 = vcmask (!%p412_p2), 261120   ;;  %v1820_v7 = vld [vmem:[%s2213_s3] sm:$0xff] (!%p412_p2)   ;;  %v1864_v8 = vmov (!%p412_p2), 0.0   ;;  %vm1865_vm1 = vmmov (!%p412_p2), 0   ;;  %v1821_v9 = vld [vmem:[%s2213_s3 + $0x8] sm:$0xff] (!%p412_p2)   ;;  %v672_v44 = vlaneseq (!%p412_p2) }
   0x6   : > { %415 = sbr.rel (%p412_p2) target bundleno = 3682 (0xe62), region = 76  ;;  %1683 = vmatprep.subr.bf16.mxu1 (!%p412_p2), %v1864_v8  ;;  %1687 = vmatprep.mubr.msk.bf16.mxu1 (!%p412_p2), %vm1865_vm1, %v1864_v8  ;;  %v1597_v14 = vld [vmem:[%s2211_s1] ss:$0 sm:$0xff] (!%p412_p2)  ;;  %v1823_v21 = vld [vmem:[%s2214_s4 + $0x8] sm:$0xff] (!%p412_p2)   ;;  %vm680_vm2 = vcmask (!%p412_p2), 64512   ;;  %s1866_s22 = smov (!%p412_p2), 120  }
   0x7   : > { %1684 = vmatpush3.bf16.msra.mxu1 (!%p412_p2), %v1820_v7  ;;  %1713 = vmatprep.subr.bf16.mxu0 (!%p412_p2), %v1864_v8  ;;  %v1598_v16 = vld [vmem:[%s2212_s2] ss:$0 sm:$0xff] (!%p412_p2)  ;;  %v1825_v23 = vld [vmem:[%s2215_s5 + $0x8] sm:$0xff] (!%p412_p2)   ;;  %vm744_vm3 = vcmask (!%p412_p2), 1043456   ;;  %v2036_v45 = vshrl.u32 (!%p412_p2), %v672_v44, 7  ;;  %v2038_v46 = vand.u32 (!%p412_p2), 127, %v672_v44 }
   0x8   : > { %1685 = vmatprep.subr.bf16.mxu1 (!%p412_p2), %v1864_v8  ;;  %1715 = vmatprep.mubr.msk.bf16.mxu0 (!%p412_p2), %vm1865_vm1, %v1864_v8  ;;  %v1822_v19 = vld [vmem:[%s2214_s4] sm:$0xff] (!%p412_p2)   ;;  %s1867_s23 = smov (!%p412_p2), 112   ;;  %s1868_s28 = smov (!%p412_p2), 104  }
   0x9   : > { %v1824_v22 = vld [vmem:[%s2215_s5] sm:$0xff] (!%p412_p2)   ;;  %vm676_vm4 = vcmp.le.s32.totalorder (!%p412_p2), %v2038_v46, %v2036_v45  ;;  %v671_v46 = vld [vmem:[%s2216_s6 + $0xc] sm:$0xf] (!%p412_p2) }
   0xb   : > { %1686 = vmatpush3.bf16.msra.mxu1 (!%p412_p2), %v1821_v9 }
   0xc   : > { %1691 = vmatprep.subr.bf16.mxu1 (!%p412_p2), %v1864_v8 }
   0xd   : > { %s2226_s30 = smov (!%p455_p3, %s1590_s30), 1 }
   0xe   : > { %s1595_s15 = sshll.u32 %s2226_s30, 3 }
   0xf   : > { %s458_s18 = scalar_lea.vmem %s2210_s0, %s1595_s15  ;;  %s462_s26 = scalar_lea.vmem %s2224_s14, %s1595_s15 }
  0x10   : > { %v1960_v0 = vld [vmem:[%s458_s18] sm:$0xff] }
  0x11   : > { %v468_v1 = vsel %vm467_vm0, %v1960_v0, 0.0 }
  0x12   : > { %469 = vadd.xlane.f32.xlu0 %v468_v1 }
  0x9f   : > { %v470_v2 = vpop.xlane.xlu0 %469 }
  0xa0   : > { %v472_v3 = vmul.f32 0.03125, %v470_v2 }
  0xa2   : > { %v473_v4 = vsub.f32 %v1960_v0, %v472_v3 }
  0xa4   : > { %v474_v5 = vmul.f32 %v473_v4, %v473_v4 }
  0xa6   : > { %v475_v6 = vsel %vm467_vm0, %v474_v5, 0.0 }
  0xa7   : > { %476 = vadd.xlane.f32.xlu0 %v475_v6 }
 0x134   : > { %v477_v10 = vpop.xlane.xlu0 %476 }
 0x135   : > { %v478_v11 = vmul.f32 0.03125, %v477_v10 }
 0x137   : > { %v479_v12 = vadd.f32 1e-05, %v478_v11 }
 0x139   : > { %1836 = vrsqrt.f32 %v479_v12 }
 0x143   : > { %v1837_v13 = vpop.eup %1836 }
 0x144   : > { %v481_v15 = vmul.f32 %v1837_v13, %v473_v4  ;;  %v669_v13 = vld [vmem:[%s2216_s6 + $0x4] sm:$0xf] }
 0x146   : > { %v488_v17 = vmul.f32 %v1597_v14, %v481_v15  ;;  %v909_v14 = vsel %vm744_vm3, %v669_v13, 0 }
 0x148   : > { %v495_v18 = vadd.f32 %v1598_v16, %v488_v17 }
 0x14a   : > { %v496_v20 = vpack.c.bf16 %v495_v18, %v495_v18 }
 0x14c   : > { %1688 = vmatmul.mubr.msk.bf16.vlgmr.msra.gmra.mrb[0].mxu1 %vm467_vm0, %v496_v20 }
 0x14d   : > { %1692 = vmatpush3.bf16.msra.mxu1 %v1822_v19  ;;  %1695 = vmatprep.mubr.msk.bf16.mxu1 %vm1865_vm1, %v1864_v8  ;;  %v668_v19 = vld [vmem:[%s2216_s6] sm:$0xf] }
 0x14e   : > { %1693 = vmatprep.subr.bf16.mxu1 %v1864_v8 }
 0x151   : > { %1694 = vmatpush3.bf16.msra.mxu1 %v1823_v21 }
 0x152   : > { %1699 = vmatprep.subr.bf16.mxu1 %v1864_v8 }
 0x154   : > { %1696 = vmatmul.mubr.msk.bf16.vlgmr.msra.gmra.mrb[4].mxu1 %vm467_vm0, %v496_v20 }
 0x155   : > { %1700 = vmatpush3.bf16.msra.mxu1 %v1824_v22  ;;  %1703 = vmatprep.mubr.msk.bf16.mxu1 %vm1865_vm1, %v1864_v8  ;;  %v955_v22 = vsel %vm744_vm3, %v668_v19, 0 }
 0x156   : > { %1701 = vmatprep.subr.bf16.mxu1 %v1864_v8 }
 0x159   : > { %1702 = vmatpush3.bf16.msra.mxu1 %v1825_v23 }
 0x15a   : > { %1707 = vmatprep.subr.bf16.mxu1 %v1864_v8 }
 0x15c   : > { %1704 = vmatmul.mubr.msk.bf16.vlgmr.msra.gmra.mrb[8].mxu1 %vm467_vm0, %v496_v20 }
 0x15d   : > { %1709 = vmatprep.mubr.msk.bf16.mxu1 %vm1865_vm1, %v1864_v8 }
 0x21f   : > { %v550_v24 = vpop.f32.mrb[0].mxu1 }
 0x220   : > { %v1689_v25 = vpop.f32.mrb[1].mxu1  ;;  %v2017_v34 = vpack.c.bf16 %v550_v24, %v550_v24 }
 0x221   : > { %v553_v26 = vpop.f32.mrb[2].mxu1 }
 0x222   : > { %v1690_v27 = vpop.f32.mrb[3].mxu1 }
 0x227   : > { %v606_v28 = vpop.f32.mrb[4].mxu1 }
 0x228   : > { %v2011_v29 = vpack.c.bf16 %v606_v28, %v606_v28  ;;  %v1697_v30 = vpop.f32.mrb[5].mxu1 }
 0x229   : > { %v609_v31 = vpop.f32.mrb[6].mxu1 }
 0x22a   : > { %793 = vrot.lane.b32.xlu1 %v2011_v29, %s1866_s22  ;;  %v1698_v32 = vpop.f32.mrb[7].mxu1  ;;  %v685_v33 = vsel %vm680_vm2, %v2011_v29, 0 }
 0x22b   : > { %1708 = vmatpush3.bf16.xpose.msra.mxu1 %v685_v33 }
 0x22c   : > { %1719 = vmatprep.subr.bf16.mxu1 %v1864_v8 }
 0x22e   : > { %790 = vrot.lane.b32.xlu1 %v2017_v34, %s1866_s22 }
 0x22f   : > { %v662_v35 = vpop.f32.mrb[8].mxu1 }
 0x230   : > { %v2022_v36 = vpack.c.bf16 %v662_v35, %v662_v35  ;;  %v1705_v37 = vpop.f32.mrb[9].mxu1 }
 0x231   : > { %v665_v38 = vpop.f32.mrb[10].mxu1 }
 0x232   : > { %v1706_v39 = vpop.f32.mrb[11].mxu1  ;;  %1710 = vmatmul.mubr.msk.bf16.vlgmr.msra.gmra.mrb[12].mxu1 %vm680_vm2, %v2017_v34  ;;  %v746_v40 = vsel %vm744_vm3, %v2022_v36, 0 }
 0x233   : > { %1714 = vmatpush3.bf16.msra.mxu0 %v746_v40  ;;  %1721 = vmatprep.mubr.msk.bf16.mxu1 %vm1865_vm1, %v1864_v8 }
 0x234   : > { %1725 = vmatprep.subr.bf16.mxu0 %v1864_v8 }
 0x29c   : > { %v794_v41 = vpop.permute.xlu1 %793 }
 0x29d   : > { %v799_v42 = vsel %vm680_vm2, %v794_v41, 0 }
 0x29e   : > { %1720 = vmatpush3.bf16.xpose.msra.mxu1 %v799_v42 }
 0x29f   : > { %1731 = vmatprep.subr.bf16.mxu1 %v1864_v8 }
 0x2a0   : > { %v791_v43 = vpop.permute.xlu1 %790 }
 0x2a5   : > { %1722 = vmatmul.mubr.msk.bf16.vlgmr.msra.gmra.mrb[16].mxu1 %vm680_vm2, %v791_v43 }
 0x2a6   : > { %1733 = vmatprep.mubr.msk.bf16.mxu1 %vm1865_vm1, %v1864_v8  ;;  %1732 = vmatpush3.bf16.msra.mxu1 %v909_v14 }
 0x2a7   : > { %1743 = vmatprep.subr.bf16.mxu1 %v1864_v8 }
 0x305   : > { %v721_v47 = vpop.f32.mrb[12].mxu1 }
 0x306   : > { %v727_v48 = vmul.f32 0.35355338, %v721_v47  ;;  %v1711_v49 = vpop.f32.mrb[13].mxu1 }
 0x307   : > { %v724_v50 = vpop.f32.mrb[14].mxu1 }
 0x308   : > { %v1712_v51 = vpop.f32.mrb[15].mxu1  ;;  %v728_v52 = vsel %vm676_vm4, %v727_v48, -1e+30 }
 0x309   : > { %v729_v53 = vsel %vm680_vm2, %v728_v52, -inf }
 0x30a   : > { %730 = vmax.xlane.f32.xlu0 %v729_v53 }
 0x378   : > { %v835_v54 = vpop.f32.mrb[16].mxu1 }
 0x379   : > { %v841_v55 = vmul.f32 0.35355338, %v835_v54  ;;  %v1723_v56 = vpop.f32.mrb[17].mxu1 }
 0x37a   : > { %v838_v57 = vpop.f32.mrb[18].mxu1 }
 0x37b   : > { %v1724_v58 = vpop.f32.mrb[19].mxu1  ;;  %v842_v59 = vsel %vm676_vm4, %v841_v55, -1e+30 }
 0x37c   : > { %v843_v60 = vsel %vm680_vm2, %v842_v59, -inf }
 0x37d   : > { %844 = vmax.xlane.f32.xlu1 %v843_v60 }
 0x38e   : > { %997 = vrot.lane.b32.xlu1 %v2017_v34, %s1867_s23 }
 0x397   : > { %v731_v61 = vpop.xlane.xlu0 %730 }
 0x398   : > { %v732_v62 = vsub.f32 %v728_v52, %v731_v61 }
 0x39a   : > { %v733_v63 = vmul.f32 1.442695, %v732_v62 }
 0x39c   : > { %1838 = vpow2.f32 %v733_v63 }
 0x3a6   : > { %v1839_v1 = vpop.eup %1838 }
 0x3a7   : > { %v735_v2 = vsel %vm680_vm2, %v1839_v1, 0.0 }
 0x3a8   : > { %736 = vadd.xlane.f32.xlu0 %v735_v2 }
 0x40a   : > { %v845_v3 = vpop.xlane.xlu1 %844 }
 0x40b   : > { %v846_v4 = vsub.f32 %v842_v59, %v845_v3 }
 0x40d   : > { %v847_v5 = vmul.f32 1.442695, %v846_v4 }
 0x40e   : > { %v998_v38 = vpop.permute.xlu1 %997 }
 0x40f   : > { %1840 = vpow2.f32 %v847_v5 }
 0x419   : > { %v1841_v6 = vpop.eup %1840 }
 0x41a   : > { %v849_v7 = vsel %vm680_vm2, %v1841_v6, 0.0 }
 0x41b   : > { %850 = vadd.xlane.f32.xlu0 %v849_v7 }
 0x431   : > { %856 = vrot.lane.b32.xlu0 %v2022_v36, %s1866_s22 }
 0x435   : > { %v737_v9 = vpop.xlane.xlu0 %736  ;;  %999 = vrot.lane.b32.xlu0 %v2011_v29, %s1867_s23 }
 0x436   : > { %1842 = vrcp.f32 %v737_v9 }
 0x440   : > { %v1843_v10 = vpop.eup %1842 }
 0x441   : > { %v739_v11 = vmul.f32 %v1843_v10, %v1839_v1 }
 0x443   : > { %v740_v12 = vpack.c.bf16 %v739_v11, %v739_v11 }
 0x445   : > { %1716 = vmatmul.mubr.msk.bf16.vlgmr.msra.gmra.mrb[0].mxu0 %vm680_vm2, %v740_v12 }
 0x446   : > { %1727 = vmatprep.mubr.msk.bf16.mxu0 %vm1865_vm1, %v1864_v8 }
 0x4a8   : > { %v851_v15 = vpop.xlane.xlu0 %850 }
 0x4a9   : > { %1844 = vrcp.f32 %v851_v15 }
 0x4ac   : > { %v857_v16 = vpop.permute.xlu0 %856 }
 0x4ad   : > { %v862_v17 = vsel %vm744_vm3, %v857_v16, 0 }
 0x4ae   : > { %1726 = vmatpush3.bf16.msra.mxu0 %v862_v17 }
 0x4af   : > { %1737 = vmatprep.subr.bf16.mxu0 %v1864_v8 }
 0x4b0   : > { %v1000_v28 = vpop.permute.xlu0 %999 }
 0x4b1   : > { %v1005_v35 = vsel %vm680_vm2, %v1000_v28, 0 }
 0x4b3   : > { %v1845_v18 = vpop.eup %1844 }
 0x4b4   : > { %v853_v20 = vmul.f32 %v1845_v18, %v1841_v6 }
 0x4b6   : > { %v854_v21 = vpack.c.bf16 %v853_v20, %v853_v20 }
 0x4b8   : > { %1728 = vmatmul.mubr.msk.bf16.vlgmr.msra.gmra.mrb[4].mxu0 %vm680_vm2, %v854_v21 }
 0x4b9   : > { %1738 = vmatpush3.bf16.msra.mxu0 %v955_v22  ;;  %1739 = vmatprep.mubr.msk.bf16.mxu0 %vm1865_vm1, %v1864_v8 }
 0x4ba   : > { %1749 = vmatprep.subr.bf16.mxu0 %v1864_v8 }
 0x518   : > { %v782_v23 = vpop.f32.mrb[0].mxu0 }
 0x519   : > { %v788_v24 = vpack.c.bf16 %v782_v23, %v782_v23  ;;  %v1717_v25 = vpop.f32.mrb[1].mxu0 }
 0x51a   : > { %v785_v26 = vpop.f32.mrb[2].mxu0 }
 0x51b   : > { %v1718_v27 = vpop.f32.mrb[3].mxu0  ;;  %1740 = vmatmul.mubr.msk.bf16.vlgmr.msra.gmra.mrb[8].mxu0 %vm680_vm2, %v788_v24 }
 0x51c   : > { %1751 = vmatprep.mubr.msk.bf16.mxu0 %vm1865_vm1, %v1864_v8 }
 0x58b   : > { %v898_v30 = vpop.f32.mrb[4].mxu0 }
 0x58c   : > { %v904_v31 = vpack.c.bf16 %v898_v30, %v898_v30  ;;  %v1729_v32 = vpop.f32.mrb[5].mxu0 }
 0x58d   : > { %v901_v33 = vpop.f32.mrb[6].mxu0 }
 0x58e   : > { %v1730_v37 = vpop.f32.mrb[7].mxu0  ;;  %1734 = vmatmul.mubr.msk.bf16.vlgmr.msra.gmra.mrb[20].mxu1 %vm680_vm2, %v904_v31 }
 0x58f   : > { %1744 = vmatpush3.bf16.xpose.msra.mxu1 %v1005_v35  ;;  %1745 = vmatprep.mubr.msk.bf16.mxu1 %vm1865_vm1, %v1864_v8 }
 0x590   : > { %1755 = vmatprep.subr.bf16.mxu1 %v1864_v8 }
 0x596   : > { %1746 = vmatmul.mubr.msk.bf16.vlgmr.msra.gmra.mrb[24].mxu1 %vm680_vm2, %v998_v38 }
 0x597   : > { %1757 = vmatprep.mubr.msk.bf16.mxu1 %vm1865_vm1, %v1864_v8 }
 0x5ee   : > { %v991_v39 = vpop.f32.mrb[8].mxu0 }
 0x5ef   : > { %v1741_v40 = vpop.f32.mrb[9].mxu0 }
 0x5f0   : > { %v994_v41 = vpop.f32.mrb[10].mxu0 }
 0x5f1   : > { %v1742_v42 = vpop.f32.mrb[11].mxu0 }
 0x661   : > { %v945_v43 = vpop.f32.mrb[20].mxu1 }
 0x662   : > { %v2087_v44 = vadd.f32 %v991_v39, %v945_v43  ;;  %v1735_v47 = vpop.f32.mrb[21].mxu1 }
 0x663   : > { %v948_v48 = vpop.f32.mrb[22].mxu1  ;;  %v1620_v47 = vld [vmem:[%s2217_s7] ss:$0 sm:$0xff] }
 0x664   : > { %v1736_v49 = vpop.f32.mrb[23].mxu1 }
 0x669   : > { %v1041_v50 = vpop.f32.mrb[24].mxu1 }
 0x66a   : > { %v1047_v51 = vmul.f32 0.35355338, %v1041_v50  ;;  %v1747_v52 = vpop.f32.mrb[25].mxu1 }
 0x66b   : > { %v1044_v53 = vpop.f32.mrb[26].mxu1 }
 0x66c   : > { %v1748_v54 = vpop.f32.mrb[27].mxu1  ;;  %v1048_v55 = vsel %vm676_vm4, %v1047_v51, -1e+30 }
 0x66d   : > { %v1049_v56 = vsel %vm680_vm2, %v1048_v55, -inf }
 0x66e   : > { %1050 = vmax.xlane.f32.xlu0 %v1049_v56 }
 0x684   : > { %1061 = vrot.lane.b32.xlu0 %v2022_v36, %s1867_s23 }
 0x688   : > { %1157 = vrot.lane.b32.xlu0 %v2017_v34, %s1868_s28 }
 0x6fb   : > { %v1051_v57 = vpop.xlane.xlu0 %1050 }
 0x6fc   : > { %v1052_v58 = vsub.f32 %v1048_v55, %v1051_v57 }
 0x6fe   : > { %v1053_v59 = vmul.f32 1.442695, %v1052_v58 }
 0x6ff   : > { %v1062_v60 = vpop.permute.xlu0 %1061 }
 0x700   : > { %1846 = vpow2.f32 %v1053_v59  ;;  %v1067_v61 = vsel %vm744_vm3, %v1062_v60, 0  ;;  %v1826_v60 = vld [vmem:[%s2220_s10] sm:$0xff]  }
 0x701   : > { %1750 = vmatpush3.bf16.msra.mxu0 %v1067_v61  ;;  %v1828_v61 = vld [vmem:[%s2222_s12] sm:$0xff]  }
 0x702   : > { %1761 = vmatprep.subr.bf16.mxu0 %v1864_v8 }
 0x703   : > { %v1158_v6 = vpop.permute.xlu0 %1157 }
 0x70a   : > { %v1847_v62 = vpop.eup %1846 }
 0x70b   : > { %v1055_v63 = vsel %vm680_vm2, %v1847_v62, 0.0 }
 0x70c   : > { %1056 = vadd.xlane.f32.xlu1 %v1055_v63  ;;  %v1830_v63 = vld [vmem:[%s2222_s12 + $0x10] sm:$0xff]  }
 0x71d   : > { %1159 = vrot.lane.b32.xlu1 %v2011_v29, %s1868_s28  ;;  %v670_v29 = vld [vmem:[%s2216_s6 + $0x8] sm:$0xf] }
 0x71e   : > { %v1114_v7 = vsel %vm744_vm3, %v670_v29, 0  ;;  %v1621_v29 = vld [vmem:[%s2218_s8] ss:$0 sm:$0xff] }
 0x71f   : > { %1756 = vmatpush3.bf16.msra.mxu1 %v1114_v7 }
 0x720   : > { %1767 = vmatprep.subr.bf16.mxu1 %v1864_v8 }
 0x799   : > { %v1057_v1 = vpop.xlane.xlu1 %1056 }
 0x79a   : > { %1848 = vrcp.f32 %v1057_v1  ;;  %v1831_v1 = vld [vmem:[%s2222_s12 + $0x18] sm:$0xff]  }
 0x79d   : > { %v1160_v3 = vpop.permute.xlu1 %1159 }
 0x79e   : > { %v1165_v5 = vsel %vm680_vm2, %v1160_v3, 0 }
 0x7a4   : > { %v1849_v34 = vpop.eup %1848 }
 0x7a5   : > { %v1059_v2 = vmul.f32 %v1849_v34, %v1847_v62  ;;  %v1829_v62 = vld [vmem:[%s2222_s12 + $0x8] sm:$0xff]   ;;  %v1832_v34 = vld [vmem:[%s2222_s12 + $0x20] sm:$0xff]  }
 0x7a7   : > { %v1060_v4 = vpack.c.bf16 %v1059_v2, %v1059_v2  ;;  %v1833_v2 = vld [vmem:[%s2222_s12 + $0x28] sm:$0xff]  }
 0x7a9   : > { %1752 = vmatmul.mubr.msk.bf16.vlgmr.msra.gmra.mrb[12].mxu0 %vm680_vm2, %v1060_v4 }
 0x7aa   : > { %1762 = vmatpush3.bf16.xpose.msra.mxu0 %v1165_v5  ;;  %1763 = vmatprep.mubr.msk.bf16.mxu0 %vm1865_vm1, %v1864_v8 }
 0x7ab   : > { %1773 = vmatprep.subr.bf16.mxu0 %v1864_v8 }
 0x7b1   : > { %1764 = vmatmul.mubr.msk.bf16.vlgmr.msra.gmra.mrb[16].mxu0 %vm680_vm2, %v1158_v6 }
 0x7b2   : > { %1775 = vmatprep.mubr.msk.bf16.mxu0 %vm1865_vm1, %v1864_v8 }
 0x87c   : > { %v1103_v9 = vpop.f32.mrb[12].mxu0 }
 0x87d   : > { %v1109_v10 = vpack.c.bf16 %v1103_v9, %v1103_v9  ;;  %v1753_v11 = vpop.f32.mrb[13].mxu0  ;;  %v1622_v9 = vld [vmem:[%s2219_s9] ss:$0 sm:$0xff] }
 0x87e   : > { %v1106_v12 = vpop.f32.mrb[14].mxu0 }
 0x87f   : > { %v1754_v13 = vpop.f32.mrb[15].mxu0  ;;  %1758 = vmatmul.mubr.msk.bf16.vlgmr.msra.gmra.mrb[28].mxu1 %vm680_vm2, %v1109_v10 }
 0x880   : > { %1769 = vmatprep.mubr.msk.bf16.mxu1 %vm1865_vm1, %v1864_v8  ;;  %v1834_v13 = vld [vmem:[%s2222_s12 + $0x30] sm:$0xff]  }
 0x884   : > { %v1201_v14 = vpop.f32.mrb[16].mxu0 }
 0x885   : > { %v1207_v15 = vmul.f32 0.35355338, %v1201_v14  ;;  %v1765_v16 = vpop.f32.mrb[17].mxu0  ;;  %v1835_v14 = vld [vmem:[%s2222_s12 + $0x38] sm:$0xff]  }
 0x886   : > { %v1204_v17 = vpop.f32.mrb[18].mxu0 }
 0x887   : > { %v1766_v18 = vpop.f32.mrb[19].mxu0  ;;  %v1208_v19 = vsel %vm676_vm4, %v1207_v15, -1e+30  ;;  %v1623_v15 = vld [vmem:[%s2221_s11] ss:$0 sm:$0xff] }
 0x888   : > { %v1209_v20 = vsel %vm680_vm2, %v1208_v19, -inf }
 0x889   : > { %1210 = vmax.xlane.f32.xlu0 %v1209_v20 }
 0x89f   : > { %1221 = vrot.lane.b32.xlu0 %v2022_v36, %s1868_s28  ;;  %v1274_v36 = vsel %vm744_vm3, %v671_v46, 0 }
 0x8a0   : > { %1774 = vmatpush3.bf16.msra.mxu0 %v1274_v36 }
 0x8a1   : > { %1787 = vmatprep.subr.bf16.mxu0 %v1864_v8 }
 0x916   : > { %v1211_v21 = vpop.xlane.xlu0 %1210 }
 0x917   : > { %v1212_v22 = vsub.f32 %v1208_v19, %v1211_v21 }
 0x919   : > { %v1213_v23 = vmul.f32 1.442695, %v1212_v22 }
 0x91a   : > { %v1222_v24 = vpop.permute.xlu0 %1221 }
 0x91b   : > { %1850 = vpow2.f32 %v1213_v23  ;;  %v1227_v25 = vsel %vm744_vm3, %v1222_v24, 0 }
 0x91c   : > { %1768 = vmatpush3.bf16.msra.mxu1 %v1227_v25 }
 0x91d   : > { %1779 = vmatprep.subr.bf16.mxu1 %v1864_v8 }
 0x925   : > { %v1851_v26 = vpop.eup %1850 }
 0x926   : > { %v1215_v45 = vsel %vm680_vm2, %v1851_v26, 0.0 }
 0x927   : > { %1216 = vadd.xlane.f32.xlu1 %v1215_v45 }
 0x952   : > { %v1150_v27 = vpop.f32.mrb[28].mxu1 }
 0x953   : > { %v1156_v28 = vadd.f32 %v1150_v27, %v2087_v44  ;;  %v1759_v30 = vpop.f32.mrb[29].mxu1 }
 0x954   : > { %v1153_v31 = vpop.f32.mrb[30].mxu1 }
 0x955   : > { %v1760_v32 = vpop.f32.mrb[31].mxu1 }
 0x9b4   : > { %v1217_v33 = vpop.xlane.xlu1 %1216 }
 0x9b5   : > { %1852 = vrcp.f32 %v1217_v33 }
 0x9bf   : > { %v1853_v35 = vpop.eup %1852 }
 0x9c0   : > { %v1219_v37 = vmul.f32 %v1853_v35, %v1851_v26 }
 0x9c2   : > { %v1220_v38 = vpack.c.bf16 %v1219_v37, %v1219_v37 }
 0x9c4   : > { %1770 = vmatmul.mubr.msk.bf16.vlgmr.msra.gmra.mrb[32].mxu1 %vm680_vm2, %v1220_v38 }
 0x9c5   : > { %1783 = vmatprep.mubr.msk.bf16.mxu1 %vm1865_vm1, %v1864_v8  ;;  %1780 = vmatpush3.bf16.msra.mxu1 %v1826_v60 }
 0x9c6   : > { %1781 = vmatprep.subr.bf16.mxu1 %v1864_v8 }
 0xa97   : > { %v1263_v39 = vpop.f32.mrb[32].mxu1 }
 0xa98   : > { %v1269_v40 = vpack.c.bf16 %v1263_v39, %v1263_v39  ;;  %v1771_v41 = vpop.f32.mrb[33].mxu1 }
 0xa99   : > { %v1266_v42 = vpop.f32.mrb[34].mxu1 }
 0xa9a   : > { %v1772_v43 = vpop.f32.mrb[35].mxu1  ;;  %1776 = vmatmul.mubr.msk.bf16.vlgmr.msra.gmra.mrb[20].mxu0 %vm680_vm2, %v1269_v40 }
 0xa9b   : > { %1803 = vmatprep.mubr.msk.bf16.mxu0 %vm1865_vm1, %v1864_v8  ;;  %1788 = vmatpush3.bf16.msra.mxu0 %v1828_v61 }
 0xa9c   : > { %1789 = vmatprep.subr.bf16.mxu0 %v1864_v8 }
 0xa9f   : > { %1790 = vmatpush3.bf16.msra.mxu0 %v1829_v62 }
 0xaa0   : > { %1791 = vmatprep.subr.bf16.mxu0 %v1864_v8 }
 0xaa3   : > { %1792 = vmatpush3.bf16.msra.mxu0 %v1830_v63 }
 0xaa4   : > { %1793 = vmatprep.subr.bf16.mxu0 %v1864_v8 }
 0xaa7   : > { %1794 = vmatpush3.bf16.msra.mxu0 %v1831_v1 }
 0xaa8   : > { %1795 = vmatprep.subr.bf16.mxu0 %v1864_v8 }
 0xaab   : > { %1796 = vmatpush3.bf16.msra.mxu0 %v1832_v34 }
 0xaac   : > { %1797 = vmatprep.subr.bf16.mxu0 %v1864_v8 }
 0xaaf   : > { %1798 = vmatpush3.bf16.msra.mxu0 %v1833_v2 }
 0xab0   : > { %1799 = vmatprep.subr.bf16.mxu0 %v1864_v8 }
 0xab3   : > { %1800 = vmatpush3.bf16.msra.mxu0 %v1834_v13 }
 0xab4   : > { %1801 = vmatprep.subr.bf16.mxu0 %v1864_v8  ;;  %v1627_v8 = vld [vmem:[%s2223_s13] ss:$0 sm:$0xff] }
 0xab7   : > { %1802 = vmatpush3.bf16.msra.mxu0 %v1835_v14 }
 0xb6d   : > { %v1310_v44 = vpop.f32.mrb[20].mxu0 }
 0xb6e   : > { %v1316_v48 = vadd.f32 %v1310_v44, %v1156_v28  ;;  %v1777_v49 = vpop.f32.mrb[21].mxu0 }
 0xb6f   : > { %v1313_v50 = vpop.f32.mrb[22].mxu0 }
 0xb70   : > { %v1324_v51 = vadd.f32 %v1620_v47, %v1316_v48  ;;  %v1778_v52 = vpop.f32.mrb[23].mxu0 }
 0xb72   : > { %v2143_v53 = vadd.f32 %v1324_v51, %v1960_v0  ;;  %v1827_v0 = vld [vmem:[%s2220_s10 + $0x8] sm:$0xff]  }
 0xb73   : > { %1782 = vmatpush3.bf16.msra.mxu1 %v1827_v0 }
 0xb74   : > { %v1328_v54 = vsel %vm467_vm0, %v2143_v53, 0.0 }
 0xb75   : > { %1329 = vadd.xlane.f32.xlu1 %v1328_v54 }
 0xc02   : > { %v1330_v55 = vpop.xlane.xlu1 %1329 }
 0xc03   : > { %v1331_v56 = vmul.f32 0.03125, %v1330_v55 }
 0xc05   : > { %v1332_v57 = vsub.f32 %v2143_v53, %v1331_v56 }
 0xc07   : > { %v1333_v58 = vmul.f32 %v1332_v57, %v1332_v57 }
 0xc09   : > { %v1334_v59 = vsel %vm467_vm0, %v1333_v58, 0.0 }
 0xc0a   : > { %1335 = vadd.xlane.f32.xlu1 %v1334_v59 }
 0xc97   : > { %v1336_v3 = vpop.xlane.xlu1 %1335 }
 0xc98   : > { %v1337_v4 = vmul.f32 0.03125, %v1336_v3 }
 0xc9a   : > { %v1338_v5 = vadd.f32 1e-05, %v1337_v4 }
 0xc9c   : > { %1854 = vrsqrt.f32 %v1338_v5 }
 0xca6   : > { %v1855_v6 = vpop.eup %1854 }
 0xca7   : > { %v1340_v7 = vmul.f32 %v1855_v6, %v1332_v57 }
 0xca9   : > { %v1347_v10 = vmul.f32 %v1621_v29, %v1340_v7 }
 0xcab   : > { %v1354_v11 = vadd.f32 %v1622_v9, %v1347_v10 }
 0xcad   : > { %v1355_v12 = vpack.c.bf16 %v1354_v11, %v1354_v11 }
 0xcaf   : > { %1784 = vmatmul.mubr.msk.bf16.vlgmr.msra.gmra.mrb[36].mxu1 %vm467_vm0, %v1355_v12 }
 0xd82   : > { %v1416_v16 = vpop.f32.mrb[36].mxu1 }
 0xd83   : > { %v1417_v17 = vadd.f32 %v1623_v15, %v1416_v16  ;;  %v1785_v18 = vpop.f32.mrb[37].mxu1 }
 0xd84   : > { %v1419_v19 = vpop.f32.mrb[38].mxu1 }
 0xd85   : > { %v1422_v20 = vmax.f32 %v1417_v17, 0.0  ;;  %v1786_v21 = vpop.f32.mrb[39].mxu1 }
 0xd87   : > { %v1423_v22 = vpack.c.bf16 %v1422_v20, %v1422_v20 }
 0xd89   : > { %1804 = vmatmul.mubr.bf16.vlgmr.msra.gmra.mrb[24].mxu0 %v1423_v22 }
 0xe5c   : > { %v1529_v23 = vpop.f32.mrb[24].mxu0 }
 0xe5d   : > { %v1530_v24 = vadd.f32 %v1627_v8, %v1529_v23  ;;  %v1805_v25 = vpop.f32.mrb[25].mxu0 }
 0xe5e   : > { %v1532_v26 = vpop.f32.mrb[26].mxu0 }
 0xe5f   : > { %v1535_v45 = vadd.f32 %v1530_v24, %v2143_v53  ;;  %v1806_v46 = vpop.f32.mrb[27].mxu0 }
 0xe61   : > { %1536 = vst.msk [vmem:[%s462_s26] sm:$0xff] %vm467_vm0, %v1535_v45 }
 0xe62 PF: > { %s24_s29 = sadd.s32 1, %s1862_s29  }
 0xe63   : > { %p21_p4 = scmp.ge.s32.totalorder %s24_s29, 4  }
 0xe65   :  { %23 = sbr.rel (!%p21_p4) target bundleno = 1 (0x1), region = 106 }

</bundles_post_ra>
